<compile_context>
chip_gen: v6e
topology: v6e:2x2x1
jax: 0.10.0
libtpu: 0.0.40
codegen_flags: <defaults>
</compile_context>

<pallas_src>
import jax
import jax.numpy as jnp
from jax.experimental import pallas as pl
from jax.experimental.pallas import tpu as pltpu

LANE = 128  # vreg lane width


def _round_up(n, m):
    return ((n + m - 1) // m) * m


def _pick_tile_b(batch):
    """Adaptive batch tile: 16-row minimum for tiny batches, 128-512 rows with
    >= 2 grid tiles for throughput batches (keeps v7x's 2nd TensorCore busy)."""
    b = max(int(batch), 1)
    if b <= 128:
        return max(16, _round_up(b, 16))
    half = _round_up((b + 1) // 2, 16)
    return max(128, min(512, half))


# Constant index_map for VMEM-resident weights/biases (fetched once).
def _const_idx(i):
    return (0, 0)


def dqn_kernel(x_ref,
               w1_ref, b1_ref,
               w2_ref, b2_ref,
               w3_ref, b3_ref,
               w4_ref, b4_ref,
               w5_ref, b5_ref,
               w6_ref, b6_ref,
               o_ref):
    """One batch tile through the whole 6-layer MLP.

    Straight-line body: the six layers are serially dependent, so there is
    nothing to pipeline inside a tile; the LLO scheduler overlaps the f32
    bias/ReLU (VALU slot) under the next layer's MXU push for free.
    """
    matmul_dtype = w1_ref.dtype  # bf16 (or f32) operands, f32 accumulation

    def linear(h, w_ref, b_ref):
        return jnp.dot(h, w_ref[...], preferred_element_type=jnp.float32) + b_ref[...]

    h = x_ref[...]
    h = jnp.maximum(linear(h, w1_ref, b1_ref), 0.0).astype(matmul_dtype)  # fc1+relu1
    h = jnp.maximum(linear(h, w2_ref, b2_ref), 0.0).astype(matmul_dtype)  # fc2+relu2
    h = jnp.maximum(linear(h, w3_ref, b3_ref), 0.0).astype(matmul_dtype)  # fc3+relu3
    h = jnp.maximum(linear(h, w4_ref, b4_ref), 0.0).astype(matmul_dtype)  # fc4+relu4
    h = jnp.maximum(linear(h, w5_ref, b5_ref), 0.0).astype(matmul_dtype)  # fc5+relu5
    o_ref[...] = linear(h, w6_ref, b6_ref).astype(o_ref.dtype)            # fc6


def prepare_params(params, matmul_dtype=jnp.bfloat16):
    """ONE-TIME prepare: zero-pad every feature dim to a LANE multiple and cast
    weights to the matmul dtype (biases stay f32).  Do this once at init and
    reuse the result for every forward call.

    params: list of (W[in, out] f32, b[1, out] f32), 6 layers.
    Returns (prepared, meta) where prepared is [(W_pad, b_pad)] and meta is
    [(d_in, d_out, d_in_padded, d_out_padded)].
    """
    prepared, meta = [], []
    for w, b in params:
        di, do = w.shape
        dip, dop = _round_up(di, LANE), _round_up(do, LANE)
        w_p = jnp.pad(w, ((0, dip - di), (0, dop - do))).astype(matmul_dtype)
        b_p = jnp.pad(b, ((0, 0), (0, dop - do))).astype(jnp.float32)
        prepared.append((w_p, b_p))
        meta.append((di, do, dip, dop))
    return prepared, meta


def dqn_forward(x, prep_params, meta, *, tile_b=None, out_dtype=jnp.float32):
    """x: [batch, state_dim] f32.  prep_params/meta: from prepare_params().

    Pads x to a lane-dense bf16 slab, runs one Pallas call with a 1-D grid over
    batch tiles (all weights resident in VMEM via constant index_maps), and
    slices the result back to (batch, n_action).
    """
    batch, state_dim = x.shape
    n_action = meta[-1][1]
    din0_p = meta[0][2]
    dout_last_p = meta[-1][3]
    matmul_dtype = prep_params[0][0].dtype

    if tile_b is None:
        tile_b = _pick_tile_b(batch)
    b_pad = _round_up(max(batch, 1), tile_b)

    # Pad input directly in the matmul dtype (no f32 zero slab, fewer wrapper ops).
    x_p = jnp.pad(x.astype(matmul_dtype),
                  ((0, b_pad - batch), (0, din0_p - state_dim)))

    flat = []
    wb_shapes = []
    for (w_p, b_p), (_, _, dip, dop) in zip(prep_params, meta):
        flat.extend([w_p, b_p])
        wb_shapes.append(((dip, dop), (1, dop)))

    # Advisory cost estimate so XLA schedules the custom call sensibly.
    flops = int(2 * b_pad * sum(dip * dop for _, _, dip, dop in meta))
    bytes_accessed = int(x_p.size * x_p.dtype.itemsize
                         + sum(int(a.size) * a.dtype.itemsize for a in flat)
                         + b_pad * dout_last_p * jnp.dtype(out_dtype).itemsize)

    # Explicit VMEM guard for the all-weights-resident design (v7x: 64 MiB).
    weight_bytes = sum(int(a.size) * a.dtype.itemsize for a in flat)
    max_feat = max(dop for _, _, _, dop in meta)
    est = (2 * weight_bytes                                                 # worst case double-buffered
           + 2 * tile_b * din0_p * jnp.dtype(matmul_dtype).itemsize         # x tiles
           + 2 * tile_b * dout_last_p * jnp.dtype(out_dtype).itemsize       # out tiles
           + 4 * tile_b * max_feat * 4)                                     # live activations headroom
    vmem_limit = int(min(max(est + (8 << 20), 32 << 20), 120 << 20))
    # TODO(synk): for nb_neurons beyond ~1.2-1.5k (resident weights > VMEM on
    # v7x), split fc3/fc4 over an extra "arbitrary" K grid axis with an f32
    # VMEM accumulator instead of keeping them whole.

    def _weight_spec(shape, single_buffer):
        if single_buffer:
            # Constant index -> fetched once; single buffer halves weight VMEM.
            return pl.BlockSpec(shape, _const_idx, pipeline_mode=pl.Buffered(1))
        return pl.BlockSpec(shape, _const_idx)

    def _run(single_buffer):
        in_specs = [pl.BlockSpec((tile_b, din0_p), lambda i: (i, 0))]
        for w_shape, b_shape in wb_shapes:
            in_specs.append(_weight_spec(w_shape, single_buffer))
            in_specs.append(_weight_spec(b_shape, single_buffer))
        return pl.pallas_call(
            dqn_kernel,
            out_shape=jax.ShapeDtypeStruct((b_pad, dout_last_p), out_dtype),
            grid=(b_pad // tile_b,),
            in_specs=in_specs,
            out_specs=pl.BlockSpec((tile_b, dout_last_p), lambda i: (i, 0)),
            compiler_params=pltpu.CompilerParams(
                dimension_semantics=("parallel",),   # shards batch tiles across v7x's 2 TCs
                vmem_limit_bytes=vmem_limit),
            cost_estimate=pl.CostEstimate(flops=flops, transcendentals=0,
                                          bytes_accessed=bytes_accessed),
        )(x_p, *flat)

    try:
        out_p = _run(single_buffer=True)
    except Exception:
        # Fallback for Pallas versions that reject Buffered(1) on resident
        # inputs: default double-buffering (correct, just 2x weight VMEM).
        out_p = _run(single_buffer=False)

    return out_p[:batch, :n_action]


def init_params(key, state_dim, nb_neurons, n_action):
    """Deterministic synthetic init mirroring the PyTorch layer shapes.

    PyTorch nn.Linear(in, out) has weight (out, in); we store the transpose
    (in, out) so the kernel does x @ W directly.
    """
    dims = [
        (state_dim, nb_neurons),        # fc1
        (nb_neurons, nb_neurons),       # fc2
        (nb_neurons, nb_neurons * 2),   # fc3
        (nb_neurons * 2, nb_neurons),   # fc4
        (nb_neurons, nb_neurons),       # fc5
        (nb_neurons, n_action),         # fc6
    ]
    params = []
    for d_in, d_out in dims:
        key, kw, kb = jax.random.split(key, 3)
        bound = 1.0 / jnp.sqrt(d_in)   # PyTorch default U(-1/sqrt(in), 1/sqrt(in))
        w = jax.random.uniform(kw, (d_in, d_out), jnp.float32, -bound, bound)
        b = jax.random.uniform(kb, (1, d_out), jnp.float32, -bound, bound)
        params.append((w, b))
    return params


def reference_forward(x, params, matmul_dtype=jnp.float32):
    """Plain-JAX reference using the same matmul dtype / f32 accumulation."""
    h = x.astype(matmul_dtype)
    for i, (w, b) in enumerate(params):
        h = jnp.dot(h, w.astype(matmul_dtype),
                    preferred_element_type=jnp.float32) + b
        if i < len(params) - 1:
            h = jnp.maximum(h, 0.0).astype(matmul_dtype)
    return h.astype(jnp.float32)


if __name__ == "__main__":
    state_dim, nb_neurons, n_action = 8, 32, 4

    key = jax.random.PRNGKey(0)
    key, kx = jax.random.split(key)
    params = init_params(key, state_dim, nb_neurons, n_action)

    # One-time prepare: pad + bf16-cast weights (hoisted out of the forward).
    prep, meta = prepare_params(params, matmul_dtype=jnp.bfloat16)

    # Tiny inference-style batch (adaptive tile -> 16 rows).
    batch = 2
    x = jax.random.normal(kx, (batch, state_dim), jnp.float32)
    out = jax.block_until_ready(dqn_forward(x, prep, meta))
    ref = reference_forward(x, params, matmul_dtype=jnp.bfloat16)
    assert out.shape == (batch, n_action)
    assert jnp.allclose(out, ref, atol=1e-3, rtol=1e-3), "mismatch vs reference (batch=2)"

    # Medium batch exercising the adaptive tile path (single 48-row tile).
    batch2 = 48
    key, kx2 = jax.random.split(key)
    x2 = jax.random.normal(kx2, (batch2, state_dim), jnp.float32)
    out2 = jax.block_until_ready(dqn_forward(x2, prep, meta))
    ref2 = reference_forward(x2, params, matmul_dtype=jnp.bfloat16)
    assert out2.shape == (batch2, n_action)
    assert jnp.allclose(out2, ref2, atol=1e-3, rtol=1e-3), "mismatch vs reference (batch=48)"

    print("KERNEL_OK")
</pallas_src>

<mosaic_0001>
module attributes {stable_mosaic.version = 11 : i64} {
  func.func @dqn_kernel(%arg0: i32, %arg1: memref<16x128xbf16, #tpu.memory_space<vmem>>, %arg2: memref<128x128xbf16, #tpu.memory_space<vmem>>, %arg3: memref<1x128xf32, #tpu.memory_space<vmem>>, %arg4: memref<128x128xbf16, #tpu.memory_space<vmem>>, %arg5: memref<1x128xf32, #tpu.memory_space<vmem>>, %arg6: memref<128x128xbf16, #tpu.memory_space<vmem>>, %arg7: memref<1x128xf32, #tpu.memory_space<vmem>>, %arg8: memref<128x128xbf16, #tpu.memory_space<vmem>>, %arg9: memref<1x128xf32, #tpu.memory_space<vmem>>, %arg10: memref<128x128xbf16, #tpu.memory_space<vmem>>, %arg11: memref<1x128xf32, #tpu.memory_space<vmem>>, %arg12: memref<128x128xbf16, #tpu.memory_space<vmem>>, %arg13: memref<1x128xf32, #tpu.memory_space<vmem>>, %arg14: memref<16x128xf32, #tpu.memory_space<vmem>>) attributes {dimension_semantics = [#tpu.dimension_semantics<parallel>], iteration_bounds = array<i64: 1>, scalar_prefetch = 0 : i64, scratch_operands = 0 : i64, tpu.core_type = #tpu.core_type<tc>, window_params = [{transform_indices = @transform_0, window_bounds = array<i64: 16, 128>}, {pipeline_mode = #tpu.pipeline_mode<synchronous>, transform_indices = @transform_1, window_bounds = array<i64: 128, 128>}, {pipeline_mode = #tpu.pipeline_mode<synchronous>, transform_indices = @transform_2, window_bounds = array<i64: 1, 128>}, {pipeline_mode = #tpu.pipeline_mode<synchronous>, transform_indices = @transform_3, window_bounds = array<i64: 128, 128>}, {pipeline_mode = #tpu.pipeline_mode<synchronous>, transform_indices = @transform_4, window_bounds = array<i64: 1, 128>}, {pipeline_mode = #tpu.pipeline_mode<synchronous>, transform_indices = @transform_5, window_bounds = array<i64: 128, 128>}, {pipeline_mode = #tpu.pipeline_mode<synchronous>, transform_indices = @transform_6, window_bounds = array<i64: 1, 128>}, {pipeline_mode = #tpu.pipeline_mode<synchronous>, transform_indices = @transform_7, window_bounds = array<i64: 128, 128>}, {pipeline_mode = #tpu.pipeline_mode<synchronous>, transform_indices = @transform_8, window_bounds = array<i64: 1, 128>}, {pipeline_mode = #tpu.pipeline_mode<synchronous>, transform_indices = @transform_9, window_bounds = array<i64: 128, 128>}, {pipeline_mode = #tpu.pipeline_mode<synchronous>, transform_indices = @transform_10, window_bounds = array<i64: 1, 128>}, {pipeline_mode = #tpu.pipeline_mode<synchronous>, transform_indices = @transform_11, window_bounds = array<i64: 128, 128>}, {pipeline_mode = #tpu.pipeline_mode<synchronous>, transform_indices = @transform_12, window_bounds = array<i64: 1, 128>}, {transform_indices = @transform_13, window_bounds = array<i64: 16, 128>}]} {
    %c0 = arith.constant 0 : index
    %c0_0 = arith.constant 0 : index
    %0 = vector.load %arg1[%c0, %c0_0] : memref<16x128xbf16, #tpu.memory_space<vmem>>, vector<16x128xbf16>
    %c0_1 = arith.constant 0 : index
    %c0_2 = arith.constant 0 : index
    %1 = vector.load %arg2[%c0_1, %c0_2] : memref<128x128xbf16, #tpu.memory_space<vmem>>, vector<128x128xbf16>
    %cst = arith.constant dense<0.000000e+00> : vector<16x128xf32>
    %2 = tpu.matmul %0, %1, %cst {dimension_numbers = #tpu.dot_dimension_numbers<[1], [0], [0], [1], [0, 0, 1, 1], [], []>} : vector<16x128xbf16>, vector<128x128xbf16>, vector<16x128xf32> -> vector<16x128xf32>
    %c0_3 = arith.constant 0 : index
    %c0_4 = arith.constant 0 : index
    %3 = vector.load %arg3[%c0_3, %c0_4] : memref<1x128xf32, #tpu.memory_space<vmem>>, vector<1x128xf32>
    %4 = vector.broadcast %3 : vector<1x128xf32> to vector<16x128xf32>
    %5 = arith.addf %2, %4 : vector<16x128xf32>
    %cst_5 = arith.constant 0.000000e+00 : f32
    %6 = vector.broadcast %cst_5 : f32 to vector<16x128xf32>
    %7 = arith.maximumf %5, %6 : vector<16x128xf32>
    %8 = arith.truncf %7 : vector<16x128xf32> to vector<16x128xbf16>
    %c0_6 = arith.constant 0 : index
    %c0_7 = arith.constant 0 : index
    %9 = vector.load %arg4[%c0_6, %c0_7] : memref<128x128xbf16, #tpu.memory_space<vmem>>, vector<128x128xbf16>
    %cst_8 = arith.constant dense<0.000000e+00> : vector<16x128xf32>
    %10 = tpu.matmul %8, %9, %cst_8 {dimension_numbers = #tpu.dot_dimension_numbers<[1], [0], [0], [1], [0, 0, 1, 1], [], []>} : vector<16x128xbf16>, vector<128x128xbf16>, vector<16x128xf32> -> vector<16x128xf32>
    %c0_9 = arith.constant 0 : index
    %c0_10 = arith.constant 0 : index
    %11 = vector.load %arg5[%c0_9, %c0_10] : memref<1x128xf32, #tpu.memory_space<vmem>>, vector<1x128xf32>
    %12 = vector.broadcast %11 : vector<1x128xf32> to vector<16x128xf32>
    %13 = arith.addf %10, %12 : vector<16x128xf32>
    %cst_11 = arith.constant 0.000000e+00 : f32
    %14 = vector.broadcast %cst_11 : f32 to vector<16x128xf32>
    %15 = arith.maximumf %13, %14 : vector<16x128xf32>
    %16 = arith.truncf %15 : vector<16x128xf32> to vector<16x128xbf16>
    %c0_12 = arith.constant 0 : index
    %c0_13 = arith.constant 0 : index
    %17 = vector.load %arg6[%c0_12, %c0_13] : memref<128x128xbf16, #tpu.memory_space<vmem>>, vector<128x128xbf16>
    %cst_14 = arith.constant dense<0.000000e+00> : vector<16x128xf32>
    %18 = tpu.matmul %16, %17, %cst_14 {dimension_numbers = #tpu.dot_dimension_numbers<[1], [0], [0], [1], [0, 0, 1, 1], [], []>} : vector<16x128xbf16>, vector<128x128xbf16>, vector<16x128xf32> -> vector<16x128xf32>
    %c0_15 = arith.constant 0 : index
    %c0_16 = arith.constant 0 : index
    %19 = vector.load %arg7[%c0_15, %c0_16] : memref<1x128xf32, #tpu.memory_space<vmem>>, vector<1x128xf32>
    %20 = vector.broadcast %19 : vector<1x128xf32> to vector<16x128xf32>
    %21 = arith.addf %18, %20 : vector<16x128xf32>
    %cst_17 = arith.constant 0.000000e+00 : f32
    %22 = vector.broadcast %cst_17 : f32 to vector<16x128xf32>
    %23 = arith.maximumf %21, %22 : vector<16x128xf32>
    %24 = arith.truncf %23 : vector<16x128xf32> to vector<16x128xbf16>
    %c0_18 = arith.constant 0 : index
    %c0_19 = arith.constant 0 : index
    %25 = vector.load %arg8[%c0_18, %c0_19] : memref<128x128xbf16, #tpu.memory_space<vmem>>, vector<128x128xbf16>
    %cst_20 = arith.constant dense<0.000000e+00> : vector<16x128xf32>
    %26 = tpu.matmul %24, %25, %cst_20 {dimension_numbers = #tpu.dot_dimension_numbers<[1], [0], [0], [1], [0, 0, 1, 1], [], []>} : vector<16x128xbf16>, vector<128x128xbf16>, vector<16x128xf32> -> vector<16x128xf32>
    %c0_21 = arith.constant 0 : index
    %c0_22 = arith.constant 0 : index
    %27 = vector.load %arg9[%c0_21, %c0_22] : memref<1x128xf32, #tpu.memory_space<vmem>>, vector<1x128xf32>
    %28 = vector.broadcast %27 : vector<1x128xf32> to vector<16x128xf32>
    %29 = arith.addf %26, %28 : vector<16x128xf32>
    %cst_23 = arith.constant 0.000000e+00 : f32
    %30 = vector.broadcast %cst_23 : f32 to vector<16x128xf32>
    %31 = arith.maximumf %29, %30 : vector<16x128xf32>
    %32 = arith.truncf %31 : vector<16x128xf32> to vector<16x128xbf16>
    %c0_24 = arith.constant 0 : index
    %c0_25 = arith.constant 0 : index
    %33 = vector.load %arg10[%c0_24, %c0_25] : memref<128x128xbf16, #tpu.memory_space<vmem>>, vector<128x128xbf16>
    %cst_26 = arith.constant dense<0.000000e+00> : vector<16x128xf32>
    %34 = tpu.matmul %32, %33, %cst_26 {dimension_numbers = #tpu.dot_dimension_numbers<[1], [0], [0], [1], [0, 0, 1, 1], [], []>} : vector<16x128xbf16>, vector<128x128xbf16>, vector<16x128xf32> -> vector<16x128xf32>
    %c0_27 = arith.constant 0 : index
    %c0_28 = arith.constant 0 : index
    %35 = vector.load %arg11[%c0_27, %c0_28] : memref<1x128xf32, #tpu.memory_space<vmem>>, vector<1x128xf32>
    %36 = vector.broadcast %35 : vector<1x128xf32> to vector<16x128xf32>
    %37 = arith.addf %34, %36 : vector<16x128xf32>
    %cst_29 = arith.constant 0.000000e+00 : f32
    %38 = vector.broadcast %cst_29 : f32 to vector<16x128xf32>
    %39 = arith.maximumf %37, %38 : vector<16x128xf32>
    %40 = arith.truncf %39 : vector<16x128xf32> to vector<16x128xbf16>
    %c0_30 = arith.constant 0 : index
    %c0_31 = arith.constant 0 : index
    %41 = vector.load %arg12[%c0_30, %c0_31] : memref<128x128xbf16, #tpu.memory_space<vmem>>, vector<128x128xbf16>
    %cst_32 = arith.constant dense<0.000000e+00> : vector<16x128xf32>
    %42 = tpu.matmul %40, %41, %cst_32 {dimension_numbers = #tpu.dot_dimension_numbers<[1], [0], [0], [1], [0, 0, 1, 1], [], []>} : vector<16x128xbf16>, vector<128x128xbf16>, vector<16x128xf32> -> vector<16x128xf32>
    %c0_33 = arith.constant 0 : index
    %c0_34 = arith.constant 0 : index
    %43 = vector.load %arg13[%c0_33, %c0_34] : memref<1x128xf32, #tpu.memory_space<vmem>>, vector<1x128xf32>
    %44 = vector.broadcast %43 : vector<1x128xf32> to vector<16x128xf32>
    %45 = arith.addf %42, %44 : vector<16x128xf32>
    %c0_35 = arith.constant 0 : index
    %c0_36 = arith.constant 0 : index
    %46 = vector.load %arg14[%c0_35, %c0_36] : memref<16x128xf32, #tpu.memory_space<vmem>>, vector<16x128xf32>
    tpu.vector_store %arg14[%c0_35, %c0_36], %45 {strides = array<i32>} : memref<16x128xf32, #tpu.memory_space<vmem>>, vector<16x128xf32>,
    return
  }
  func.func @transform_0(%arg0: i32) -> (i32, i32) {
    %c0_i32 = arith.constant 0 : i32
    %c0_i32_0 = arith.constant 0 : i32
    return %arg0, %c0_i32 : i32, i32
  }
  func.func @transform_1(%arg0: i32) -> (i32, i32) {
    %c0_i32 = arith.constant 0 : i32
    %c0_i32_0 = arith.constant 0 : i32
    %c0_i32_1 = arith.constant 0 : i32
    return %c0_i32, %c0_i32_0 : i32, i32
  }
  func.func @transform_2(%arg0: i32) -> (i32, i32) {
    %c0_i32 = arith.constant 0 : i32
    %c0_i32_0 = arith.constant 0 : i32
    %c0_i32_1 = arith.constant 0 : i32
    return %c0_i32, %c0_i32_0 : i32, i32
  }
  func.func @transform_3(%arg0: i32) -> (i32, i32) {
    %c0_i32 = arith.constant 0 : i32
    %c0_i32_0 = arith.constant 0 : i32
    %c0_i32_1 = arith.constant 0 : i32
    return %c0_i32, %c0_i32_0 : i32, i32
  }
  func.func @transform_4(%arg0: i32) -> (i32, i32) {
    %c0_i32 = arith.constant 0 : i32
    %c0_i32_0 = arith.constant 0 : i32
    %c0_i32_1 = arith.constant 0 : i32
    return %c0_i32, %c0_i32_0 : i32, i32
  }
  func.func @transform_5(%arg0: i32) -> (i32, i32) {
    %c0_i32 = arith.constant 0 : i32
    %c0_i32_0 = arith.constant 0 : i32
    %c0_i32_1 = arith.constant 0 : i32
    return %c0_i32, %c0_i32_0 : i32, i32
  }
  func.func @transform_6(%arg0: i32) -> (i32, i32) {
    %c0_i32 = arith.constant 0 : i32
    %c0_i32_0 = arith.constant 0 : i32
    %c0_i32_1 = arith.constant 0 : i32
    return %c0_i32, %c0_i32_0 : i32, i32
  }
  func.func @transform_7(%arg0: i32) -> (i32, i32) {
    %c0_i32 = arith.constant 0 : i32
    %c0_i32_0 = arith.constant 0 : i32
    %c0_i32_1 = arith.constant 0 : i32
    return %c0_i32, %c0_i32_0 : i32, i32
  }
  func.func @transform_8(%arg0: i32) -> (i32, i32) {
    %c0_i32 = arith.constant 0 : i32
    %c0_i32_0 = arith.constant 0 : i32
    %c0_i32_1 = arith.constant 0 : i32
    return %c0_i32, %c0_i32_0 : i32, i32
  }
  func.func @transform_9(%arg0: i32) -> (i32, i32) {
    %c0_i32 = arith.constant 0 : i32
    %c0_i32_0 = arith.constant 0 : i32
    %c0_i32_1 = arith.constant 0 : i32
    return %c0_i32, %c0_i32_0 : i32, i32
  }
  func.func @transform_10(%arg0: i32) -> (i32, i32) {
    %c0_i32 = arith.constant 0 : i32
    %c0_i32_0 = arith.constant 0 : i32
    %c0_i32_1 = arith.constant 0 : i32
    return %c0_i32, %c0_i32_0 : i32, i32
  }
  func.func @transform_11(%arg0: i32) -> (i32, i32) {
    %c0_i32 = arith.constant 0 : i32
    %c0_i32_0 = arith.constant 0 : i32
    %c0_i32_1 = arith.constant 0 : i32
    return %c0_i32, %c0_i32_0 : i32, i32
  }
  func.func @transform_12(%arg0: i32) -> (i32, i32) {
    %c0_i32 = arith.constant 0 : i32
    %c0_i32_0 = arith.constant 0 : i32
    %c0_i32_1 = arith.constant 0 : i32
    return %c0_i32, %c0_i32_0 : i32, i32
  }
  func.func @transform_13(%arg0: i32) -> (i32, i32) {
    %c0_i32 = arith.constant 0 : i32
    %c0_i32_0 = arith.constant 0 : i32
    return %arg0, %c0_i32 : i32, i32
  }
}

module attributes {stable_mosaic.version = 11 : i64} {
  func.func @dqn_kernel(%arg0: i32, %arg1: memref<16x128xbf16, #tpu.memory_space<vmem>>, %arg2: memref<128x128xbf16, #tpu.memory_space<vmem>>, %arg3: memref<1x128xf32, #tpu.memory_space<vmem>>, %arg4: memref<128x128xbf16, #tpu.memory_space<vmem>>, %arg5: memref<1x128xf32, #tpu.memory_space<vmem>>, %arg6: memref<128x128xbf16, #tpu.memory_space<vmem>>, %arg7: memref<1x128xf32, #tpu.memory_space<vmem>>, %arg8: memref<128x128xbf16, #tpu.memory_space<vmem>>, %arg9: memref<1x128xf32, #tpu.memory_space<vmem>>, %arg10: memref<128x128xbf16, #tpu.memory_space<vmem>>, %arg11: memref<1x128xf32, #tpu.memory_space<vmem>>, %arg12: memref<128x128xbf16, #tpu.memory_space<vmem>>, %arg13: memref<1x128xf32, #tpu.memory_space<vmem>>, %arg14: memref<16x128xf32, #tpu.memory_space<vmem>>) attributes {dimension_semantics = [#tpu.dimension_semantics<parallel>], iteration_bounds = array<i64: 1>, scalar_prefetch = 0 : i64, scratch_operands = 0 : i64, tpu.core_type = #tpu.core_type<tc>, window_params = [{transform_indices = @transform_0, window_bounds = array<i64: 16, 128>}, {pipeline_mode = #tpu.pipeline_mode<synchronous>, transform_indices = @transform_1, window_bounds = array<i64: 128, 128>}, {pipeline_mode = #tpu.pipeline_mode<synchronous>, transform_indices = @transform_2, window_bounds = array<i64: 1, 128>}, {pipeline_mode = #tpu.pipeline_mode<synchronous>, transform_indices = @transform_3, window_bounds = array<i64: 128, 128>}, {pipeline_mode = #tpu.pipeline_mode<synchronous>, transform_indices = @transform_4, window_bounds = array<i64: 1, 128>}, {pipeline_mode = #tpu.pipeline_mode<synchronous>, transform_indices = @transform_5, window_bounds = array<i64: 128, 128>}, {pipeline_mode = #tpu.pipeline_mode<synchronous>, transform_indices = @transform_6, window_bounds = array<i64: 1, 128>}, {pipeline_mode = #tpu.pipeline_mode<synchronous>, transform_indices = @transform_7, window_bounds = array<i64: 128, 128>}, {pipeline_mode = #tpu.pipeline_mode<synchronous>, transform_indices = @transform_8, window_bounds = array<i64: 1, 128>}, {pipeline_mode = #tpu.pipeline_mode<synchronous>, transform_indices = @transform_9, window_bounds = array<i64: 128, 128>}, {pipeline_mode = #tpu.pipeline_mode<synchronous>, transform_indices = @transform_10, window_bounds = array<i64: 1, 128>}, {pipeline_mode = #tpu.pipeline_mode<synchronous>, transform_indices = @transform_11, window_bounds = array<i64: 128, 128>}, {pipeline_mode = #tpu.pipeline_mode<synchronous>, transform_indices = @transform_12, window_bounds = array<i64: 1, 128>}, {transform_indices = @transform_13, window_bounds = array<i64: 16, 128>}]} {
    %c0 = arith.constant 0 : index
    %c0_0 = arith.constant 0 : index
    %0 = vector.load %arg1[%c0, %c0_0] : memref<16x128xbf16, #tpu.memory_space<vmem>>, vector<16x128xbf16>
    %c0_1 = arith.constant 0 : index
    %c0_2 = arith.constant 0 : index
    %1 = vector.load %arg2[%c0_1, %c0_2] : memref<128x128xbf16, #tpu.memory_space<vmem>>, vector<128x128xbf16>
    %cst = arith.constant dense<0.000000e+00> : vector<16x128xf32>
    %2 = tpu.matmul %0, %1, %cst {dimension_numbers = #tpu.dot_dimension_numbers<[1], [0], [0], [1], [0, 0, 1, 1], [], []>} : vector<16x128xbf16>, vector<128x128xbf16>, vector<16x128xf32> -> vector<16x128xf32>
    %c0_3 = arith.constant 0 : index
    %c0_4 = arith.constant 0 : index
    %3 = vector.load %arg3[%c0_3, %c0_4] : memref<1x128xf32, #tpu.memory_space<vmem>>, vector<1x128xf32>
    %4 = vector.broadcast %3 : vector<1x128xf32> to vector<16x128xf32>
    %5 = arith.addf %2, %4 : vector<16x128xf32>
    %cst_5 = arith.constant 0.000000e+00 : f32
    %6 = vector.broadcast %cst_5 : f32 to vector<16x128xf32>
    %7 = arith.maximumf %5, %6 : vector<16x128xf32>
    %8 = arith.truncf %7 : vector<16x128xf32> to vector<16x128xbf16>
    %c0_6 = arith.constant 0 : index
    %c0_7 = arith.constant 0 : index
    %9 = vector.load %arg4[%c0_6, %c0_7] : memref<128x128xbf16, #tpu.memory_space<vmem>>, vector<128x128xbf16>
    %cst_8 = arith.constant dense<0.000000e+00> : vector<16x128xf32>
    %10 = tpu.matmul %8, %9, %cst_8 {dimension_numbers = #tpu.dot_dimension_numbers<[1], [0], [0], [1], [0, 0, 1, 1], [], []>} : vector<16x128xbf16>, vector<128x128xbf16>, vector<16x128xf32> -> vector<16x128xf32>
    %c0_9 = arith.constant 0 : index
    %c0_10 = arith.constant 0 : index
    %11 = vector.load %arg5[%c0_9, %c0_10] : memref<1x128xf32, #tpu.memory_space<vmem>>, vector<1x128xf32>
    %12 = vector.broadcast %11 : vector<1x128xf32> to vector<16x128xf32>
    %13 = arith.addf %10, %12 : vector<16x128xf32>
    %cst_11 = arith.constant 0.000000e+00 : f32
    %14 = vector.broadcast %cst_11 : f32 to vector<16x128xf32>
    %15 = arith.maximumf %13, %14 : vector<16x128xf32>
    %16 = arith.truncf %15 : vector<16x128xf32> to vector<16x128xbf16>
    %c0_12 = arith.constant 0 : index
    %c0_13 = arith.constant 0 : index
    %17 = vector.load %arg6[%c0_12, %c0_13] : memref<128x128xbf16, #tpu.memory_space<vmem>>, vector<128x128xbf16>
    %cst_14 = arith.constant dense<0.000000e+00> : vector<16x128xf32>
    %18 = tpu.matmul %16, %17, %cst_14 {dimension_numbers = #tpu.dot_dimension_numbers<[1], [0], [0], [1], [0, 0, 1, 1], [], []>} : vector<16x128xbf16>, vector<128x128xbf16>, vector<16x128xf32> -> vector<16x128xf32>
    %c0_15 = arith.constant 0 : index
    %c0_16 = arith.constant 0 : index
    %19 = vector.load %arg7[%c0_15, %c0_16] : memref<1x128xf32, #tpu.memory_space<vmem>>, vector<1x128xf32>
    %20 = vector.broadcast %19 : vector<1x128xf32> to vector<16x128xf32>
    %21 = arith.addf %18, %20 : vector<16x128xf32>
    %cst_17 = arith.constant 0.000000e+00 : f32
    %22 = vector.broadcast %cst_17 : f32 to vector<16x128xf32>
    %23 = arith.maximumf %21, %22 : vector<16x128xf32>
    %24 = arith.truncf %23 : vector<16x128xf32> to vector<16x128xbf16>
    %c0_18 = arith.constant 0 : index
    %c0_19 = arith.constant 0 : index
    %25 = vector.load %arg8[%c0_18, %c0_19] : memref<128x128xbf16, #tpu.memory_space<vmem>>, vector<128x128xbf16>
    %cst_20 = arith.constant dense<0.000000e+00> : vector<16x128xf32>
    %26 = tpu.matmul %24, %25, %cst_20 {dimension_numbers = #tpu.dot_dimension_numbers<[1], [0], [0], [1], [0, 0, 1, 1], [], []>} : vector<16x128xbf16>, vector<128x128xbf16>, vector<16x128xf32> -> vector<16x128xf32>
    %c0_21 = arith.constant 0 : index
    %c0_22 = arith.constant 0 : index
    %27 = vector.load %arg9[%c0_21, %c0_22] : memref<1x128xf32, #tpu.memory_space<vmem>>, vector<1x128xf32>
    %28 = vector.broadcast %27 : vector<1x128xf32> to vector<16x128xf32>
    %29 = arith.addf %26, %28 : vector<16x128xf32>
    %cst_23 = arith.constant 0.000000e+00 : f32
    %30 = vector.broadcast %cst_23 : f32 to vector<16x128xf32>
    %31 = arith.maximumf %29, %30 : vector<16x128xf32>
    %32 = arith.truncf %31 : vector<16x128xf32> to vector<16x128xbf16>
    %c0_24 = arith.constant 0 : index
    %c0_25 = arith.constant 0 : index
    %33 = vector.load %arg10[%c0_24, %c0_25] : memref<128x128xbf16, #tpu.memory_space<vmem>>, vector<128x128xbf16>
    %cst_26 = arith.constant dense<0.000000e+00> : vector<16x128xf32>
    %34 = tpu.matmul %32, %33, %cst_26 {dimension_numbers = #tpu.dot_dimension_numbers<[1], [0], [0], [1], [0, 0, 1, 1], [], []>} : vector<16x128xbf16>, vector<128x128xbf16>, vector<16x128xf32> -> vector<16x128xf32>
    %c0_27 = arith.constant 0 : index
    %c0_28 = arith.constant 0 : index
    %35 = vector.load %arg11[%c0_27, %c0_28] : memref<1x128xf32, #tpu.memory_space<vmem>>, vector<1x128xf32>
    %36 = vector.broadcast %35 : vector<1x128xf32> to vector<16x128xf32>
    %37 = arith.addf %34, %36 : vector<16x128xf32>
    %cst_29 = arith.constant 0.000000e+00 : f32
    %38 = vector.broadcast %cst_29 : f32 to vector<16x128xf32>
    %39 = arith.maximumf %37, %38 : vector<16x128xf32>
    %40 = arith.truncf %39 : vector<16x128xf32> to vector<16x128xbf16>
    %c0_30 = arith.constant 0 : index
    %c0_31 = arith.constant 0 : index
    %41 = vector.load %arg12[%c0_30, %c0_31] : memref<128x128xbf16, #tpu.memory_space<vmem>>, vector<128x128xbf16>
    %cst_32 = arith.constant dense<0.000000e+00> : vector<16x128xf32>
    %42 = tpu.matmul %40, %41, %cst_32 {dimension_numbers = #tpu.dot_dimension_numbers<[1], [0], [0], [1], [0, 0, 1, 1], [], []>} : vector<16x128xbf16>, vector<128x128xbf16>, vector<16x128xf32> -> vector<16x128xf32>
    %c0_33 = arith.constant 0 : index
    %c0_34 = arith.constant 0 : index
    %43 = vector.load %arg13[%c0_33, %c0_34] : memref<1x128xf32, #tpu.memory_space<vmem>>, vector<1x128xf32>
    %44 = vector.broadcast %43 : vector<1x128xf32> to vector<16x128xf32>
    %45 = arith.addf %42, %44 : vector<16x128xf32>
    %c0_35 = arith.constant 0 : index
    %c0_36 = arith.constant 0 : index
    %46 = vector.load %arg14[%c0_35, %c0_36] : memref<16x128xf32, #tpu.memory_space<vmem>>, vector<16x128xf32>
    tpu.vector_store %arg14[%c0_35, %c0_36], %45 {strides = array<i32>} : memref<16x128xf32, #tpu.memory_space<vmem>>, vector<16x128xf32>,
    return
  }
  func.func @transform_0(%arg0: i32) -> (i32, i32) {
    %c0_i32 = arith.constant 0 : i32
    %c0_i32_0 = arith.constant 0 : i32
    return %arg0, %c0_i32 : i32, i32
  }
  func.func @transform_1(%arg0: i32) -> (i32, i32) {
    %c0_i32 = arith.constant 0 : i32
    %c0_i32_0 = arith.constant 0 : i32
    %c0_i32_1 = arith.constant 0 : i32
    return %c0_i32, %c0_i32_0 : i32, i32
  }
  func.func @transform_2(%arg0: i32) -> (i32, i32) {
    %c0_i32 = arith.constant 0 : i32
    %c0_i32_0 = arith.constant 0 : i32
    %c0_i32_1 = arith.constant 0 : i32
    return %c0_i32, %c0_i32_0 : i32, i32
  }
  func.func @transform_3(%arg0: i32) -> (i32, i32) {
    %c0_i32 = arith.constant 0 : i32
    %c0_i32_0 = arith.constant 0 : i32
    %c0_i32_1 = arith.constant 0 : i32
    return %c0_i32, %c0_i32_0 : i32, i32
  }
  func.func @transform_4(%arg0: i32) -> (i32, i32) {
    %c0_i32 = arith.constant 0 : i32
    %c0_i32_0 = arith.constant 0 : i32
    %c0_i32_1 = arith.constant 0 : i32
    return %c0_i32, %c0_i32_0 : i32, i32
  }
  func.func @transform_5(%arg0: i32) -> (i32, i32) {
    %c0_i32 = arith.constant 0 : i32
    %c0_i32_0 = arith.constant 0 : i32
    %c0_i32_1 = arith.constant 0 : i32
    return %c0_i32, %c0_i32_0 : i32, i32
  }
  func.func @transform_6(%arg0: i32) -> (i32, i32) {
    %c0_i32 = arith.constant 0 : i32
    %c0_i32_0 = arith.constant 0 : i32
    %c0_i32_1 = arith.constant 0 : i32
    return %c0_i32, %c0_i32_0 : i32, i32
  }
  func.func @transform_7(%arg0: i32) -> (i32, i32) {
    %c0_i32 = arith.constant 0 : i32
    %c0_i32_0 = arith.constant 0 : i32
    %c0_i32_1 = arith.constant 0 : i32
    return %c0_i32, %c0_i32_0 : i32, i32
  }
  func.func @transform_8(%arg0: i32) -> (i32, i32) {
    %c0_i32 = arith.constant 0 : i32
    %c0_i32_0 = arith.constant 0 : i32
    %c0_i32_1 = arith.constant 0 : i32
    return %c0_i32, %c0_i32_0 : i32, i32
  }
  func.func @transform_9(%arg0: i32) -> (i32, i32) {
    %c0_i32 = arith.constant 0 : i32
    %c0_i32_0 = arith.constant 0 : i32
    %c0_i32_1 = arith.constant 0 : i32
    return %c0_i32, %c0_i32_0 : i32, i32
  }
  func.func @transform_10(%arg0: i32) -> (i32, i32) {
    %c0_i32 = arith.constant 0 : i32
    %c0_i32_0 = arith.constant 0 : i32
    %c0_i32_1 = arith.constant 0 : i32
    return %c0_i32, %c0_i32_0 : i32, i32
  }
  func.func @transform_11(%arg0: i32) -> (i32, i32) {
    %c0_i32 = arith.constant 0 : i32
    %c0_i32_0 = arith.constant 0 : i32
    %c0_i32_1 = arith.constant 0 : i32
    return %c0_i32, %c0_i32_0 : i32, i32
  }
  func.func @transform_12(%arg0: i32) -> (i32, i32) {
    %c0_i32 = arith.constant 0 : i32
    %c0_i32_0 = arith.constant 0 : i32
    %c0_i32_1 = arith.constant 0 : i32
    return %c0_i32, %c0_i32_0 : i32, i32
  }
  func.func @transform_13(%arg0: i32) -> (i32, i32) {
    %c0_i32 = arith.constant 0 : i32
    %c0_i32_0 = arith.constant 0 : i32
    return %arg0, %c0_i32 : i32, i32
  }
}

</mosaic_0001>

<bundles_post_ra>
// kernel: tpu_custom_call.1
= control target key start
LH: loop header
LB: loop body
LE: loop exit
PB: predicated region body
PF: predicated region fallthrough
CT: control target
= control target key end

     0   :  { %18 = vsyncpa [#allocation3], 0  ;;  %s1527_s0 = inlined_call_operand.hbm [shape: bf16[16,128], index: 0, kind: input, shape index: {}]   ;;  %s1528_s1 = inlined_call_operand.hbm [shape: bf16[128,128], index: 1, kind: input, shape index: {}]   ;;  %s1529_s2 = inlined_call_operand.vmem [shape: f32[1,128], index: 2, kind: input, shape index: {}]   ;;  %s1530_s3 = inlined_call_operand.hbm [shape: bf16[128,128], index: 3, kind: input, shape index: {}]   ;;  %s1531_s4 = inlined_call_operand.vmem [shape: f32[1,128], index: 4, kind: input, shape index: {}]   ;;  %s1532_s5 = inlined_call_operand.hbm [shape: bf16[128,128], index: 5, kind: input, shape index: {}]   ;;  %s1533_s6 = inlined_call_operand.vmem [shape: f32[1,128], index: 6, kind: input, shape index: {}]   ;;  %s1534_s7 = inlined_call_operand.hbm [shape: bf16[128,128], index: 7, kind: input, shape index: {}]   ;;  %s1535_s8 = inlined_call_operand.vmem [shape: f32[1,128], index: 8, kind: input, shape index: {}]   ;;  %s1536_s9 = inlined_call_operand.hbm [shape: bf16[128,128], index: 9, kind: input, shape index: {}]   ;;  %s1537_s10 = inlined_call_operand.vmem [shape: f32[1,128], index: 10, kind: input, shape index: {}]   ;;  %s1538_s11 = inlined_call_operand.hbm [shape: bf16[128,128], index: 11, kind: input, shape index: {}]   ;;  %s1539_s12 = inlined_call_operand.vmem [shape: f32[1,128], index: 12, kind: input, shape index: {}]   ;;  %s1540_s13 = inlined_call_operand.hbm [shape: f32[16,128], index: 13, kind: output, shape index: {}]  }
   0x1   :  { %19 = vsyncpa [#allocation6], 0 }
   0x2   :  { %20 = vsyncpa [#allocation9], 0 }
   0x3   :  { %21 = vsyncpa [#allocation12], 0 }
   0x4   :  { %22 = vsyncpa [#allocation4], 0  ;;  %s1320_s25 = smov [#allocation5]   ;;  %s1321_s27 = smov [#allocation8]  }
   0x5   :  { %s40_s26 = sshll.u32 %s1320_s25, 4  ;;  %s68_s28 = sshll.u32 %s1321_s27, 4  ;;  %s41_s26 = int_to_ptr.vmem [resolvable:$true] %s40_s26  ;;  %s69_s28 = int_to_ptr.vmem [resolvable:$true] %s68_s28 }
   0x6   :  { %s1158_s29 = scalar_lea.vmem %s41_s26, 1024  ;;  %p1163_p1 = scmp.lt.s32.totalorder %s41_s26, %s41_s26 }
   0x7   :  { %p1159_p0 = scmp.ne.s32.totalorder %s41_s26, %s1158_s29  ;;  %p1164_p2 = scmp.lt.s32.totalorder %s1158_s29, %s1158_s29 }
   0x9   :  { %p1165_p3 = por %p1164_p2, %p1163_p1 }
   0xb   :  { %p1166_p4 = pnand %p1165_p3, %p1159_p0 }
   0xd   :  { %1169 = shalt.err (!%p1166_p4)
}
   0xe   :  { %s1322_s30 = smov 64   ;;  %s1323_s14 = smov 4  }
   0xf   :  { %46 = dma.hbm_to_vmem [thread:$0]  %s1528_s1, 1024, %s41_s26, [#allocation6], %s1322_s30, %s1322_s30, %s1323_s14  }
  0x10   :  { %s1178_s17 = scalar_lea.vmem %s69_s28, 1024  ;;  %p1183_p6 = scmp.lt.s32.totalorder %s69_s28, %s69_s28 }
  0x11   :  { %p1179_p5 = scmp.ne.s32.totalorder %s69_s28, %s1178_s17  ;;  %p1184_p7 = scmp.lt.s32.totalorder %s1178_s17, %s1178_s17 }
  0x13   :  { %p1185_p8 = por %p1184_p7, %p1183_p6 }
  0x15   :  { %p1186_p9 = pnand %p1185_p8, %p1179_p5 }
  0x17   :  { %1189 = shalt.err (!%p1186_p9)
}
  0x18   :  { %74 = dma.hbm_to_vmem [thread:$0]  %s1532_s5, 1024, %s69_s28, [#allocation9], %s1322_s30, %s1322_s30, %s1323_s14  }
  0x19   :  { %s1324_s20 = smov [#allocation11]   ;;  %s1325_s22 = smov [#allocation2]  }
  0x1a   :  { %s96_s21 = sshll.u32 %s1324_s20, 4  ;;  %s28_s23 = sshll.u32 %s1325_s22, 4  ;;  %s97_s21 = int_to_ptr.vmem [resolvable:$true] %s96_s21  ;;  %s29_s23 = int_to_ptr.vmem [resolvable:$true] %s28_s23 }
  0x1b   :  { %s1198_s1 = scalar_lea.vmem %s97_s21, 1024  ;;  %p1203_p11 = scmp.lt.s32.totalorder %s97_s21, %s97_s21 }
  0x1c   :  { %p1199_p10 = scmp.ne.s32.totalorder %s97_s21, %s1198_s1  ;;  %p1204_p12 = scmp.lt.s32.totalorder %s1198_s1, %s1198_s1 }
  0x1e   :  { %p1205_p13 = por %p1204_p12, %p1203_p11 }
  0x20   :  { %p1206_p0 = pnand %p1205_p13, %p1199_p10 }
  0x22   :  { %1209 = shalt.err (!%p1206_p0)
}
  0x23   :  { %102 = dma.hbm_to_vmem [thread:$0]  %s1536_s9, 1024, %s97_s21, [#allocation12], %s1322_s30, %s1322_s30, %s1323_s14  }
  0x24   :  { %s1218_s5 = scalar_lea.vmem %s29_s23, 128  ;;  %p1223_p2 = scmp.lt.s32.totalorder %s29_s23, %s29_s23 }
  0x25   :  { %p1219_p1 = scmp.ne.s32.totalorder %s29_s23, %s1218_s5  ;;  %p1224_p3 = scmp.lt.s32.totalorder %s1218_s5, %s1218_s5 }
  0x27   :  { %p1225_p4 = por %p1224_p3, %p1223_p2 }
  0x29   :  { %p1226_p5 = pnand %p1225_p4, %p1219_p1 }
  0x2b   :  { %1229 = shalt.err (!%p1226_p5)
}
  0x2c   :  { %34 = dma.hbm_to_vmem [thread:$0]  %s1527_s0, 128, %s29_s23, [#allocation3], %s1322_s30, %s1322_s30, %s1323_s14  }
  0x2d   :  { %s1326_s28 = smov [#allocation7]   ;;  %s1327_s15 = smov [#allocation10]  }
  0x2e   :  { %s54_s29 = sshll.u32 %s1326_s28, 4  ;;  %s82_s16 = sshll.u32 %s1327_s15, 4  ;;  %s55_s29 = int_to_ptr.vmem [resolvable:$true] %s54_s29  ;;  %s83_s16 = int_to_ptr.vmem [resolvable:$true] %s82_s16 }
  0x2f   :  { %s1238_s9 = scalar_lea.vmem %s55_s29, 1024  ;;  %p1243_p7 = scmp.lt.s32.totalorder %s55_s29, %s55_s29 }
  0x30   :  { %p1239_p6 = scmp.ne.s32.totalorder %s55_s29, %s1238_s9  ;;  %p1244_p8 = scmp.lt.s32.totalorder %s1238_s9, %s1238_s9 }
  0x32   :  { %p1245_p9 = por %p1244_p8, %p1243_p7 }
  0x34   :  { %p1246_p10 = pnand %p1245_p9, %p1239_p6 }
  0x36   :  { %1249 = shalt.err (!%p1246_p10)
}
  0x37   :  { %60 = dma.hbm_to_vmem [thread:$0]  %s1530_s3, 1024, %s55_s29, [#allocation6], %s1322_s30, %s1322_s30, %s1323_s14  }
  0x38   :  { %s1258_s0 = scalar_lea.vmem %s83_s16, 1024  ;;  %p1263_p12 = scmp.lt.s32.totalorder %s83_s16, %s83_s16 }
  0x39   :  { %p1259_p11 = scmp.ne.s32.totalorder %s83_s16, %s1258_s0  ;;  %p1264_p13 = scmp.lt.s32.totalorder %s1258_s0, %s1258_s0 }
  0x3b   :  { %p1265_p0 = por %p1264_p13, %p1263_p12 }
  0x3d   :  { %p1266_p1 = pnand %p1265_p0, %p1259_p11 }
  0x3f   :  { %1269 = shalt.err (!%p1266_p1)
}
  0x40   :  { %88 = dma.hbm_to_vmem [thread:$0]  %s1534_s7, 1024, %s83_s16, [#allocation9], %s1322_s30, %s1322_s30, %s1323_s14  }
  0x41   :  { %s1328_s21 = smov [#allocation13]  }
  0x42   :  { %s110_s22 = sshll.u32 %s1328_s21, 4  ;;  %s111_s22 = int_to_ptr.vmem [resolvable:$true] %s110_s22 }
  0x43   :  { %s1278_s23 = scalar_lea.vmem %s111_s22, 1024  ;;  %p1283_p3 = scmp.lt.s32.totalorder %s111_s22, %s111_s22 }
  0x44   :  { %p1279_p2 = scmp.ne.s32.totalorder %s111_s22, %s1278_s23  ;;  %p1284_p4 = scmp.lt.s32.totalorder %s1278_s23, %s1278_s23 }
  0x46   :  { %p1285_p5 = por %p1284_p4, %p1283_p3 }
  0x48   :  { %p1286_p6 = pnand %p1285_p5, %p1279_p2 }
  0x4a   :  { %1289 = shalt.err (!%p1286_p6)
}
  0x4b   :  { %116 = dma.hbm_to_vmem [thread:$0]  %s1538_s11, 1024, %s111_s22, [#allocation12], %s1322_s30, %s1322_s30, %s1323_s14  }
  0x4c   :  { %1310 = dma.done.wait [#allocation3], 128  }
  0x4d   :  { %1311 = vsyncadd [#allocation3], 4294967168 }
  0x4e   :  { %1312 = dma.done.wait [#allocation6], 2048  }
  0x4f   :  { %1313 = vsyncadd [#allocation6], 4294965248 }
  0x50   :  { %1314 = dma.done.wait [#allocation9], 2048  }
  0x51   :  { %1315 = vsyncadd [#allocation9], 4294965248 }
  0x52   :  { %1316 = dma.done.wait [#allocation12], 2048  }
  0x53   :  { %1317 = vsyncadd [#allocation12], 4294965248  ;;  %v1329_v0 = vmov 0.0   ;;  %vm1330_vm0 = vmmov 0   ;;  %v1101_v1 = vld [vmem:[#allocation5 + $0x38] sm:$0xff]   ;;  %v1102_v2 = vld [vmem:[#allocation5 + $0x30] sm:$0xff]  }
  0x54   :  { %967 = vmatprep.subr.bf16.mxu0 %v1329_v0  ;;  %983 = vmatprep.mubr.msk.bf16.mxu0 %vm1330_vm0, %v1329_v0  ;;  %v1103_v3 = vld [vmem:[#allocation5 + $0x28] sm:$0xff]   ;;  %v1110_v4 = vld [vmem:[#allocation7 + $0x38] sm:$0xff]   ;;  %v1104_v5 = vld [vmem:[#allocation5 + $0x20] sm:$0xff]   ;;  %s1331_s27 = smov [#allocation14]  }
  0x55   :  { %987 = vmatprep.subr.bf16.mxu1 %v1329_v0  ;;  %1003 = vmatprep.mubr.msk.bf16.mxu1 %vm1330_vm0, %v1329_v0  ;;  %v1111_v6 = vld [vmem:[#allocation7 + $0x30] sm:$0xff]   ;;  %v1105_v7 = vld [vmem:[#allocation5 + $0x18] sm:$0xff]   ;;  %v1112_v8 = vld [vmem:[#allocation7 + $0x28] sm:$0xff]   ;;  %s843_s28 = sshll.u32 %s1331_s27, 4  ;;  %s844_s28 = int_to_ptr.vmem [resolvable:$true] %s843_s28 }
  0x56   :  { %968 = vmatpush3.bf16.msra.mxu0 %v1101_v1  ;;  %988 = vmatpush3.bf16.msra.mxu1 %v1110_v4  ;;  %v1106_v9 = vld [vmem:[#allocation5 + $0x10] sm:$0xff]   ;;  %v1113_v10 = vld [vmem:[#allocation7 + $0x20] sm:$0xff]   ;;  %v1107_v11 = vld [vmem:[#allocation5 + $0x8] sm:$0xff]   ;;  %p1295_p8 = scmp.lt.s32.totalorder %s844_s28, %s844_s28 }
  0x57   :  { %969 = vmatprep.subr.bf16.mxu0 %v1329_v0  ;;  %989 = vmatprep.subr.bf16.mxu1 %v1329_v0  ;;  %v1114_v12 = vld [vmem:[#allocation7 + $0x18] sm:$0xff]   ;;  %v1108_v13 = vld [vmem:[#allocation5] sm:$0xff]   ;;  %v1115_v15 = vld [vmem:[#allocation7 + $0x10] sm:$0xff]  }
  0x58   :  { %v1109_v14 = vld [vmem:[#allocation2] sm:$0xff]   ;;  %v1116_v16 = vld [vmem:[#allocation7 + $0x8] sm:$0xff]   ;;  %v1117_v17 = vld [vmem:[#allocation7] sm:$0xff]  }
  0x59   :  { %v1118_v18 = vld [vmem:[#allocation8 + $0x38] sm:$0xff]   ;;  %v1119_v19 = vld [vmem:[#allocation8 + $0x30] sm:$0xff]   ;;  %v1120_v20 = vld [vmem:[#allocation8 + $0x28] sm:$0xff]  }
  0x5a   :  { %970 = vmatpush3.bf16.msra.mxu0 %v1102_v2  ;;  %990 = vmatpush3.bf16.msra.mxu1 %v1111_v6  ;;  %v1121_v21 = vld [vmem:[#allocation8 + $0x20] sm:$0xff]   ;;  %v1122_v22 = vld [vmem:[#allocation8 + $0x18] sm:$0xff]   ;;  %v1123_v33 = vld [vmem:[#allocation8 + $0x10] sm:$0xff]  }
  0x5b   :  { %971 = vmatprep.subr.bf16.mxu0 %v1329_v0  ;;  %991 = vmatprep.subr.bf16.mxu1 %v1329_v0  ;;  %v858_v23 = vld [vmem:[%s1529_s2] ss:$0 sm:$0xff]  ;;  %v1124_v34 = vld [vmem:[#allocation8 + $0x8] sm:$0xff]   ;;  %v1125_v35 = vld [vmem:[#allocation8] sm:$0xff]  }
  0x5c   :  { %v1126_v36 = vld [vmem:[#allocation10 + $0x38] sm:$0xff]   ;;  %v1127_v37 = vld [vmem:[#allocation10 + $0x30] sm:$0xff]   ;;  %v1128_v38 = vld [vmem:[#allocation10 + $0x28] sm:$0xff]  }
  0x5d   :  { %v1129_v39 = vld [vmem:[#allocation10 + $0x20] sm:$0xff]   ;;  %v1130_v40 = vld [vmem:[#allocation10 + $0x18] sm:$0xff]   ;;  %v1131_v51 = vld [vmem:[#allocation10 + $0x10] sm:$0xff]  }
  0x5e   :  { %972 = vmatpush3.bf16.msra.mxu0 %v1103_v3  ;;  %992 = vmatpush3.bf16.msra.mxu1 %v1112_v8  ;;  %v868_v41 = vld [vmem:[%s1531_s4] ss:$0 sm:$0xff]  ;;  %v1132_v52 = vld [vmem:[#allocation10 + $0x8] sm:$0xff]   ;;  %v1133_v53 = vld [vmem:[#allocation10] sm:$0xff]  }
  0x5f   :  { %973 = vmatprep.subr.bf16.mxu0 %v1329_v0  ;;  %993 = vmatprep.subr.bf16.mxu1 %v1329_v0  ;;  %v1134_v54 = vld [vmem:[#allocation11 + $0x38] sm:$0xff]   ;;  %v1135_v55 = vld [vmem:[#allocation11 + $0x30] sm:$0xff]   ;;  %v1136_v56 = vld [vmem:[#allocation11 + $0x28] sm:$0xff]  }
  0x60   :  { %v1137_v57 = vld [vmem:[#allocation11 + $0x20] sm:$0xff]   ;;  %v1138_v58 = vld [vmem:[#allocation11 + $0x18] sm:$0xff]   ;;  %v1139_v6 = vld [vmem:[#allocation11 + $0x10] sm:$0xff]  }
  0x61   :  { %v877_v59 = vld [vmem:[%s1533_s6] ss:$0 sm:$0xff]  ;;  %v1141_v8 = vld [vmem:[#allocation11] sm:$0xff]  }
  0x62   :  { %974 = vmatpush3.bf16.msra.mxu0 %v1104_v5  ;;  %994 = vmatpush3.bf16.msra.mxu1 %v1113_v10  ;;  %v1143_v10 = vld [vmem:[#allocation13 + $0x30] sm:$0xff]  }
  0x63   :  { %975 = vmatprep.subr.bf16.mxu0 %v1329_v0  ;;  %995 = vmatprep.subr.bf16.mxu1 %v1329_v0 }
  0x66   :  { %976 = vmatpush3.bf16.msra.mxu0 %v1105_v7  ;;  %996 = vmatpush3.bf16.msra.mxu1 %v1114_v12  ;;  %v1140_v7 = vld [vmem:[#allocation11 + $0x8] sm:$0xff]   ;;  %v1145_v12 = vld [vmem:[#allocation13 + $0x20] sm:$0xff]  }
  0x67   :  { %977 = vmatprep.subr.bf16.mxu0 %v1329_v0  ;;  %997 = vmatprep.subr.bf16.mxu1 %v1329_v0 }
  0x6a   :  { %978 = vmatpush3.bf16.msra.mxu0 %v1106_v9  ;;  %998 = vmatpush3.bf16.msra.mxu1 %v1115_v15  ;;  %v1142_v9 = vld [vmem:[#allocation13 + $0x38] sm:$0xff]  }
  0x6b   :  { %979 = vmatprep.subr.bf16.mxu0 %v1329_v0  ;;  %999 = vmatprep.subr.bf16.mxu1 %v1329_v0 }
  0x6e   :  { %980 = vmatpush3.bf16.msra.mxu0 %v1107_v11  ;;  %1000 = vmatpush3.bf16.msra.mxu1 %v1116_v16  ;;  %v1144_v11 = vld [vmem:[#allocation13 + $0x28] sm:$0xff]  }
  0x6f   :  { %981 = vmatprep.subr.bf16.mxu0 %v1329_v0  ;;  %1001 = vmatprep.subr.bf16.mxu1 %v1329_v0 }
  0x72   :  { %982 = vmatpush3.bf16.msra.mxu0 %v1108_v13  ;;  %1002 = vmatpush3.bf16.msra.mxu1 %v1117_v17  ;;  %v1146_v13 = vld [vmem:[#allocation13 + $0x18] sm:$0xff]  }
  0x73   :  { %1007 = vmatprep.subr.bf16.mxu0 %v1329_v0  ;;  %1027 = vmatprep.subr.bf16.mxu1 %v1329_v0 }
  0x75   :  { %984 = vmatmul.mubr.bf16.vlgmr.msra.gmra.mxu0 %v1109_v14  ;;  %v886_v14 = vld [vmem:[%s1535_s8] ss:$0 sm:$0xff] }
  0x76   :  { %1023 = vmatprep.mubr.msk.bf16.mxu0 %vm1330_vm0, %v1329_v0  ;;  %1008 = vmatpush3.bf16.msra.mxu0 %v1118_v18 }
  0x77   :  { %1009 = vmatprep.subr.bf16.mxu0 %v1329_v0 }
  0x7a   :  { %1010 = vmatpush3.bf16.msra.mxu0 %v1119_v19 }
  0x7b   :  { %1011 = vmatprep.subr.bf16.mxu0 %v1329_v0 }
  0x7e   :  { %1012 = vmatpush3.bf16.msra.mxu0 %v1120_v20 }
  0x7f   :  { %1013 = vmatprep.subr.bf16.mxu0 %v1329_v0 }
  0x82   :  { %1014 = vmatpush3.bf16.msra.mxu0 %v1121_v21 }
  0x83   :  { %1015 = vmatprep.subr.bf16.mxu0 %v1329_v0 }
  0x86   :  { %1016 = vmatpush3.bf16.msra.mxu0 %v1122_v22 }
  0x87   :  { %1017 = vmatprep.subr.bf16.mxu0 %v1329_v0 }
  0x8a   :  { %1018 = vmatpush3.bf16.msra.mxu0 %v1123_v33 }
  0x8b   :  { %1019 = vmatprep.subr.bf16.mxu0 %v1329_v0 }
  0x8e   :  { %1020 = vmatpush3.bf16.msra.mxu0 %v1124_v34 }
  0x8f   :  { %1021 = vmatprep.subr.bf16.mxu0 %v1329_v0 }
  0x92   :  { %1022 = vmatpush3.bf16.msra.mxu0 %v1125_v35 }
  0x93   :  { %1047 = vmatprep.subr.bf16.mxu0 %v1329_v0 }
 0x135   :  { %v254_v24 = vpop.f32.mrf.mxu0 }
 0x136   :  { %v255_v26 = vadd.f32 %v858_v23, %v254_v24  ;;  %v1147_v24 = vld [vmem:[#allocation13 + $0x10] sm:$0xff]  }
 0x137   :  { %v985_v25 = vpop.f32.mrf.mxu0 }
 0x138   :  { %v261_v30 = vmax.f32 %v255_v26, 0.0  ;;  %v1148_v25 = vld [vmem:[#allocation13 + $0x8] sm:$0xff]   ;;  %v1149_v26 = vld [vmem:[#allocation13] sm:$0xff]  }
 0x139   :  { %v257_v27 = vpop.f32.mrf.mxu0 }
 0x13a   :  { %v258_v28 = vadd.f32 %v858_v23, %v257_v27  ;;  %v895_v27 = vld [vmem:[%s1537_s10] ss:$0 sm:$0xff]  ;;  %s1290_s10 = scalar_lea.vmem %s844_s28, 256 }
 0x13b   :  { %v986_v29 = vpop.f32.mrf.mxu0  ;;  %p1291_p7 = scmp.ne.s32.totalorder %s844_s28, %s1290_s10  ;;  %p1296_p9 = scmp.lt.s32.totalorder %s1290_s10, %s1290_s10 }
 0x13c   :  { %v262_v31 = vmax.f32 %v258_v28, 0.0 }
 0x13d   :  { %p1297_p10 = por %p1296_p9, %p1295_p8 }
 0x13e   :  { %v263_v32 = vpack.c.bf16 %v262_v31, %v261_v30 }
 0x13f   :  { %p1298_p11 = pnand %p1297_p10, %p1291_p7 }
 0x140   :  { %1004 = vmatmul.mubr.bf16.vlgmr.msra.gmra.mxu1 %v263_v32 }
 0x141   :  { %1043 = vmatprep.mubr.msk.bf16.mxu1 %vm1330_vm0, %v1329_v0  ;;  %1028 = vmatpush3.bf16.msra.mxu1 %v1126_v36 }
 0x142   :  { %1029 = vmatprep.subr.bf16.mxu1 %v1329_v0 }
 0x145   :  { %1030 = vmatpush3.bf16.msra.mxu1 %v1127_v37 }
 0x146   :  { %1031 = vmatprep.subr.bf16.mxu1 %v1329_v0 }
 0x149   :  { %1032 = vmatpush3.bf16.msra.mxu1 %v1128_v38 }
 0x14a   :  { %1033 = vmatprep.subr.bf16.mxu1 %v1329_v0 }
 0x14d   :  { %1034 = vmatpush3.bf16.msra.mxu1 %v1129_v39 }
 0x14e   :  { %1035 = vmatprep.subr.bf16.mxu1 %v1329_v0 }
 0x151   :  { %1036 = vmatpush3.bf16.msra.mxu1 %v1130_v40 }
 0x152   :  { %1037 = vmatprep.subr.bf16.mxu1 %v1329_v0 }
 0x155   :  { %1038 = vmatpush3.bf16.msra.mxu1 %v1131_v51 }
 0x156   :  { %1039 = vmatprep.subr.bf16.mxu1 %v1329_v0 }
 0x159   :  { %1040 = vmatpush3.bf16.msra.mxu1 %v1132_v52 }
 0x15a   :  { %1041 = vmatprep.subr.bf16.mxu1 %v1329_v0 }
 0x15d   :  { %1042 = vmatpush3.bf16.msra.mxu1 %v1133_v53 }
 0x15e   :  { %1067 = vmatprep.subr.bf16.mxu1 %v1329_v0 }
 0x200   :  { %v369_v42 = vpop.f32.mrf.mxu1 }
 0x201   :  { %v370_v44 = vadd.f32 %v868_v41, %v369_v42 }
 0x202   :  { %v1005_v43 = vpop.f32.mrf.mxu1 }
 0x203   :  { %v376_v48 = vmax.f32 %v370_v44, 0.0 }
 0x204   :  { %v372_v45 = vpop.f32.mrf.mxu1 }
 0x205   :  { %v373_v46 = vadd.f32 %v868_v41, %v372_v45 }
 0x206   :  { %v1006_v47 = vpop.f32.mrf.mxu1 }
 0x207   :  { %v377_v49 = vmax.f32 %v373_v46, 0.0 }
 0x209   :  { %v378_v50 = vpack.c.bf16 %v377_v49, %v376_v48 }
 0x20b   :  { %1024 = vmatmul.mubr.bf16.vlgmr.msra.gmra.mxu0 %v378_v50 }
 0x20c   :  { %1063 = vmatprep.mubr.msk.bf16.mxu0 %vm1330_vm0, %v1329_v0  ;;  %1048 = vmatpush3.bf16.msra.mxu0 %v1134_v54 }
 0x20d   :  { %1049 = vmatprep.subr.bf16.mxu0 %v1329_v0 }
 0x210   :  { %1050 = vmatpush3.bf16.msra.mxu0 %v1135_v55 }
 0x211   :  { %1051 = vmatprep.subr.bf16.mxu0 %v1329_v0 }
 0x214   :  { %1052 = vmatpush3.bf16.msra.mxu0 %v1136_v56 }
 0x215   :  { %1053 = vmatprep.subr.bf16.mxu0 %v1329_v0 }
 0x218   :  { %1054 = vmatpush3.bf16.msra.mxu0 %v1137_v57 }
 0x219   :  { %1055 = vmatprep.subr.bf16.mxu0 %v1329_v0 }
 0x21c   :  { %1056 = vmatpush3.bf16.msra.mxu0 %v1138_v58 }
 0x21d   :  { %1057 = vmatprep.subr.bf16.mxu0 %v1329_v0 }
 0x220   :  { %1058 = vmatpush3.bf16.msra.mxu0 %v1139_v6 }
 0x221   :  { %1059 = vmatprep.subr.bf16.mxu0 %v1329_v0 }
 0x224   :  { %1060 = vmatpush3.bf16.msra.mxu0 %v1140_v7 }
 0x225   :  { %1061 = vmatprep.subr.bf16.mxu0 %v1329_v0 }
 0x228   :  { %1062 = vmatpush3.bf16.msra.mxu0 %v1141_v8 }
 0x2cb   :  { %v484_v60 = vpop.f32.mrf.mxu0 }
 0x2cc   :  { %v485_v62 = vadd.f32 %v877_v59, %v484_v60 }
 0x2cd   :  { %v1025_v61 = vpop.f32.mrf.mxu0 }
 0x2ce   :  { %v491_v3 = vmax.f32 %v485_v62, 0.0 }
 0x2cf   :  { %v487_v63 = vpop.f32.mrf.mxu0 }
 0x2d0   :  { %v488_v1 = vadd.f32 %v877_v59, %v487_v63 }
 0x2d1   :  { %v1026_v2 = vpop.f32.mrf.mxu0 }
 0x2d2   :  { %v492_v4 = vmax.f32 %v488_v1, 0.0 }
 0x2d4   :  { %v493_v5 = vpack.c.bf16 %v492_v4, %v491_v3 }
 0x2d6   :  { %1044 = vmatmul.mubr.bf16.vlgmr.msra.gmra.mxu1 %v493_v5 }
 0x2d7   :  { %1083 = vmatprep.mubr.msk.bf16.mxu1 %vm1330_vm0, %v1329_v0  ;;  %1068 = vmatpush3.bf16.msra.mxu1 %v1142_v9 }
 0x2d8   :  { %1069 = vmatprep.subr.bf16.mxu1 %v1329_v0 }
 0x2db   :  { %1070 = vmatpush3.bf16.msra.mxu1 %v1143_v10 }
 0x2dc   :  { %1071 = vmatprep.subr.bf16.mxu1 %v1329_v0 }
 0x2df   :  { %1072 = vmatpush3.bf16.msra.mxu1 %v1144_v11 }
 0x2e0   :  { %1073 = vmatprep.subr.bf16.mxu1 %v1329_v0 }
 0x2e3   :  { %1074 = vmatpush3.bf16.msra.mxu1 %v1145_v12 }
 0x2e4   :  { %1075 = vmatprep.subr.bf16.mxu1 %v1329_v0 }
 0x2e7   :  { %1076 = vmatpush3.bf16.msra.mxu1 %v1146_v13 }
 0x2e8   :  { %1077 = vmatprep.subr.bf16.mxu1 %v1329_v0 }
 0x2eb   :  { %1078 = vmatpush3.bf16.msra.mxu1 %v1147_v24 }
 0x2ec   :  { %1079 = vmatprep.subr.bf16.mxu1 %v1329_v0 }
 0x2ef   :  { %1080 = vmatpush3.bf16.msra.mxu1 %v1148_v25 }
 0x2f0   :  { %1081 = vmatprep.subr.bf16.mxu1 %v1329_v0  ;;  %v904_v0 = vld [vmem:[%s1539_s12] ss:$0 sm:$0xff] }
 0x2f3   :  { %1082 = vmatpush3.bf16.msra.mxu1 %v1149_v26 }
 0x396   :  { %v599_v15 = vpop.f32.mrf.mxu1 }
 0x397   :  { %v600_v17 = vadd.f32 %v886_v14, %v599_v15 }
 0x398   :  { %v1045_v16 = vpop.f32.mrf.mxu1 }
 0x399   :  { %v606_v21 = vmax.f32 %v600_v17, 0.0 }
 0x39a   :  { %v602_v18 = vpop.f32.mrf.mxu1 }
 0x39b   :  { %v603_v19 = vadd.f32 %v886_v14, %v602_v18 }
 0x39c   :  { %v1046_v20 = vpop.f32.mrf.mxu1 }
 0x39d   :  { %v607_v22 = vmax.f32 %v603_v19, 0.0 }
 0x39f   :  { %v608_v23 = vpack.c.bf16 %v607_v22, %v606_v21 }
 0x3a1   :  { %1064 = vmatmul.mubr.bf16.vlgmr.msra.gmra.mxu0 %v608_v23 }
 0x461   :  { %v714_v28 = vpop.f32.mrf.mxu0 }
 0x462   :  { %v715_v30 = vadd.f32 %v895_v27, %v714_v28 }
 0x463   :  { %v1065_v29 = vpop.f32.mrf.mxu0 }
 0x464   :  { %v721_v34 = vmax.f32 %v715_v30, 0.0 }
 0x465   :  { %v717_v31 = vpop.f32.mrf.mxu0 }
 0x466   :  { %v718_v32 = vadd.f32 %v895_v27, %v717_v31 }
 0x467   :  { %v1066_v33 = vpop.f32.mrf.mxu0 }
 0x468   :  { %v722_v35 = vmax.f32 %v718_v32, 0.0 }
 0x46a   :  { %v723_v36 = vpack.c.bf16 %v722_v35, %v721_v34 }
 0x46c   :  { %1084 = vmatmul.mubr.bf16.vlgmr.msra.gmra.mxu1 %v723_v36 }
 0x52c   :  { %v829_v37 = vpop.f32.mrf.mxu1 }
 0x52d   :  { %v830_v38 = vadd.f32 %v904_v0, %v829_v37 }
 0x52e   :  { %v1085_v39 = vpop.f32.mrf.mxu1 }
 0x52f   :  { %836 = vst [vmem:[#allocation14] sm:$0xff] %v830_v38 }
 0x530   :  { %v832_v40 = vpop.f32.mrf.mxu1 }
 0x531   :  { %v833_v41 = vadd.f32 %v904_v0, %v832_v40 }
 0x532   :  { %v1086_v42 = vpop.f32.mrf.mxu1 }
 0x533   :  { %837 = vst [vmem:[#allocation14 + $0x8] sm:$0xff] %v833_v41 }
 0x534   :  { %1301 = shalt.err (!%p1298_p11)
}
 0x535   :  { %s1332_s29 = smov 128   ;;  %s1333_s12 = smov 8  }
 0x536   :  { %849 = dma.vmem_to_hbm [thread:$0]  %s844_s28, 256, %s1540_s13, [#allocation4], %s1332_s29, %s1332_s29, %s1333_s12  }
 0x537   :  { %1318 = dma.done.wait [#allocation4], 256  }
 0x538   :  { %1319 = vsyncadd [#allocation4], 4294967040 }
 0x539   :  { %853 = vsyncpa [#allocation3], 1 }
 0x53a   :  { %854 = vsyncpa [#allocation6], 1 }
 0x53b   :  { %855 = vsyncpa [#allocation9], 1 }
 0x53c   :  { %856 = vsyncpa [#allocation12], 1 }
 0x53d   :  { %857 = vsyncpa [#allocation4], 1 }

// kernel: tpu_custom_call.1
= control target key start
LH: loop header
LB: loop body
LE: loop exit
PB: predicated region body
PF: predicated region fallthrough
CT: control target
= control target key end

     0   :  { %18 = vsyncpa [#allocation3], 0  ;;  %s1527_s0 = inlined_call_operand.hbm [shape: bf16[16,128], index: 0, kind: input, shape index: {}]   ;;  %s1528_s1 = inlined_call_operand.hbm [shape: bf16[128,128], index: 1, kind: input, shape index: {}]   ;;  %s1529_s2 = inlined_call_operand.vmem [shape: f32[1,128], index: 2, kind: input, shape index: {}]   ;;  %s1530_s3 = inlined_call_operand.hbm [shape: bf16[128,128], index: 3, kind: input, shape index: {}]   ;;  %s1531_s4 = inlined_call_operand.vmem [shape: f32[1,128], index: 4, kind: input, shape index: {}]   ;;  %s1532_s5 = inlined_call_operand.hbm [shape: bf16[128,128], index: 5, kind: input, shape index: {}]   ;;  %s1533_s6 = inlined_call_operand.vmem [shape: f32[1,128], index: 6, kind: input, shape index: {}]   ;;  %s1534_s7 = inlined_call_operand.hbm [shape: bf16[128,128], index: 7, kind: input, shape index: {}]   ;;  %s1535_s8 = inlined_call_operand.vmem [shape: f32[1,128], index: 8, kind: input, shape index: {}]   ;;  %s1536_s9 = inlined_call_operand.hbm [shape: bf16[128,128], index: 9, kind: input, shape index: {}]   ;;  %s1537_s10 = inlined_call_operand.vmem [shape: f32[1,128], index: 10, kind: input, shape index: {}]   ;;  %s1538_s11 = inlined_call_operand.hbm [shape: bf16[128,128], index: 11, kind: input, shape index: {}]   ;;  %s1539_s12 = inlined_call_operand.vmem [shape: f32[1,128], index: 12, kind: input, shape index: {}]   ;;  %s1540_s13 = inlined_call_operand.hbm [shape: f32[16,128], index: 13, kind: output, shape index: {}]  }
   0x1   :  { %19 = vsyncpa [#allocation6], 0 }
   0x2   :  { %20 = vsyncpa [#allocation9], 0 }
   0x3   :  { %21 = vsyncpa [#allocation12], 0 }
   0x4   :  { %22 = vsyncpa [#allocation4], 0  ;;  %s1320_s25 = smov [#allocation5]   ;;  %s1321_s27 = smov [#allocation8]  }
   0x5   :  { %s40_s26 = sshll.u32 %s1320_s25, 4  ;;  %s68_s28 = sshll.u32 %s1321_s27, 4  ;;  %s41_s26 = int_to_ptr.vmem [resolvable:$true] %s40_s26  ;;  %s69_s28 = int_to_ptr.vmem [resolvable:$true] %s68_s28 }
   0x6   :  { %s1158_s29 = scalar_lea.vmem %s41_s26, 1024  ;;  %p1163_p1 = scmp.lt.s32.totalorder %s41_s26, %s41_s26 }
   0x7   :  { %p1159_p0 = scmp.ne.s32.totalorder %s41_s26, %s1158_s29  ;;  %p1164_p2 = scmp.lt.s32.totalorder %s1158_s29, %s1158_s29 }
   0x9   :  { %p1165_p3 = por %p1164_p2, %p1163_p1 }
   0xb   :  { %p1166_p4 = pnand %p1165_p3, %p1159_p0 }
   0xd   :  { %1169 = shalt.err (!%p1166_p4)
}
   0xe   :  { %s1322_s30 = smov 64   ;;  %s1323_s14 = smov 4  }
   0xf   :  { %46 = dma.hbm_to_vmem [thread:$0]  %s1528_s1, 1024, %s41_s26, [#allocation6], %s1322_s30, %s1322_s30, %s1323_s14  }
  0x10   :  { %s1178_s17 = scalar_lea.vmem %s69_s28, 1024  ;;  %p1183_p6 = scmp.lt.s32.totalorder %s69_s28, %s69_s28 }
  0x11   :  { %p1179_p5 = scmp.ne.s32.totalorder %s69_s28, %s1178_s17  ;;  %p1184_p7 = scmp.lt.s32.totalorder %s1178_s17, %s1178_s17 }
  0x13   :  { %p1185_p8 = por %p1184_p7, %p1183_p6 }
  0x15   :  { %p1186_p9 = pnand %p1185_p8, %p1179_p5 }
  0x17   :  { %1189 = shalt.err (!%p1186_p9)
}
  0x18   :  { %74 = dma.hbm_to_vmem [thread:$0]  %s1532_s5, 1024, %s69_s28, [#allocation9], %s1322_s30, %s1322_s30, %s1323_s14  }
  0x19   :  { %s1324_s20 = smov [#allocation11]   ;;  %s1325_s22 = smov [#allocation2]  }
  0x1a   :  { %s96_s21 = sshll.u32 %s1324_s20, 4  ;;  %s28_s23 = sshll.u32 %s1325_s22, 4  ;;  %s97_s21 = int_to_ptr.vmem [resolvable:$true] %s96_s21  ;;  %s29_s23 = int_to_ptr.vmem [resolvable:$true] %s28_s23 }
  0x1b   :  { %s1198_s1 = scalar_lea.vmem %s97_s21, 1024  ;;  %p1203_p11 = scmp.lt.s32.totalorder %s97_s21, %s97_s21 }
  0x1c   :  { %p1199_p10 = scmp.ne.s32.totalorder %s97_s21, %s1198_s1  ;;  %p1204_p12 = scmp.lt.s32.totalorder %s1198_s1, %s1198_s1 }
  0x1e   :  { %p1205_p13 = por %p1204_p12, %p1203_p11 }
  0x20   :  { %p1206_p0 = pnand %p1205_p13, %p1199_p10 }
  0x22   :  { %1209 = shalt.err (!%p1206_p0)
}
  0x23   :  { %102 = dma.hbm_to_vmem [thread:$0]  %s1536_s9, 1024, %s97_s21, [#allocation12], %s1322_s30, %s1322_s30, %s1323_s14  }
  0x24   :  { %s1218_s5 = scalar_lea.vmem %s29_s23, 128  ;;  %p1223_p2 = scmp.lt.s32.totalorder %s29_s23, %s29_s23 }
  0x25   :  { %p1219_p1 = scmp.ne.s32.totalorder %s29_s23, %s1218_s5  ;;  %p1224_p3 = scmp.lt.s32.totalorder %s1218_s5, %s1218_s5 }
  0x27   :  { %p1225_p4 = por %p1224_p3, %p1223_p2 }
  0x29   :  { %p1226_p5 = pnand %p1225_p4, %p1219_p1 }
  0x2b   :  { %1229 = shalt.err (!%p1226_p5)
}
  0x2c   :  { %34 = dma.hbm_to_vmem [thread:$0]  %s1527_s0, 128, %s29_s23, [#allocation3], %s1322_s30, %s1322_s30, %s1323_s14  }
  0x2d   :  { %s1326_s28 = smov [#allocation7]   ;;  %s1327_s15 = smov [#allocation10]  }
  0x2e   :  { %s54_s29 = sshll.u32 %s1326_s28, 4  ;;  %s82_s16 = sshll.u32 %s1327_s15, 4  ;;  %s55_s29 = int_to_ptr.vmem [resolvable:$true] %s54_s29  ;;  %s83_s16 = int_to_ptr.vmem [resolvable:$true] %s82_s16 }
  0x2f   :  { %s1238_s9 = scalar_lea.vmem %s55_s29, 1024  ;;  %p1243_p7 = scmp.lt.s32.totalorder %s55_s29, %s55_s29 }
  0x30   :  { %p1239_p6 = scmp.ne.s32.totalorder %s55_s29, %s1238_s9  ;;  %p1244_p8 = scmp.lt.s32.totalorder %s1238_s9, %s1238_s9 }
  0x32   :  { %p1245_p9 = por %p1244_p8, %p1243_p7 }
  0x34   :  { %p1246_p10 = pnand %p1245_p9, %p1239_p6 }
  0x36   :  { %1249 = shalt.err (!%p1246_p10)
}
  0x37   :  { %60 = dma.hbm_to_vmem [thread:$0]  %s1530_s3, 1024, %s55_s29, [#allocation6], %s1322_s30, %s1322_s30, %s1323_s14  }
  0x38   :  { %s1258_s0 = scalar_lea.vmem %s83_s16, 1024  ;;  %p1263_p12 = scmp.lt.s32.totalorder %s83_s16, %s83_s16 }
  0x39   :  { %p1259_p11 = scmp.ne.s32.totalorder %s83_s16, %s1258_s0  ;;  %p1264_p13 = scmp.lt.s32.totalorder %s1258_s0, %s1258_s0 }
  0x3b   :  { %p1265_p0 = por %p1264_p13, %p1263_p12 }
  0x3d   :  { %p1266_p1 = pnand %p1265_p0, %p1259_p11 }
  0x3f   :  { %1269 = shalt.err (!%p1266_p1)
}
  0x40   :  { %88 = dma.hbm_to_vmem [thread:$0]  %s1534_s7, 1024, %s83_s16, [#allocation9], %s1322_s30, %s1322_s30, %s1323_s14  }
  0x41   :  { %s1328_s21 = smov [#allocation13]  }
  0x42   :  { %s110_s22 = sshll.u32 %s1328_s21, 4  ;;  %s111_s22 = int_to_ptr.vmem [resolvable:$true] %s110_s22 }
  0x43   :  { %s1278_s23 = scalar_lea.vmem %s111_s22, 1024  ;;  %p1283_p3 = scmp.lt.s32.totalorder %s111_s22, %s111_s22 }
  0x44   :  { %p1279_p2 = scmp.ne.s32.totalorder %s111_s22, %s1278_s23  ;;  %p1284_p4 = scmp.lt.s32.totalorder %s1278_s23, %s1278_s23 }
  0x46   :  { %p1285_p5 = por %p1284_p4, %p1283_p3 }
  0x48   :  { %p1286_p6 = pnand %p1285_p5, %p1279_p2 }
  0x4a   :  { %1289 = shalt.err (!%p1286_p6)
}
  0x4b   :  { %116 = dma.hbm_to_vmem [thread:$0]  %s1538_s11, 1024, %s111_s22, [#allocation12], %s1322_s30, %s1322_s30, %s1323_s14  }
  0x4c   :  { %1310 = dma.done.wait [#allocation3], 128  }
  0x4d   :  { %1311 = vsyncadd [#allocation3], 4294967168 }
  0x4e   :  { %1312 = dma.done.wait [#allocation6], 2048  }
  0x4f   :  { %1313 = vsyncadd [#allocation6], 4294965248 }
  0x50   :  { %1314 = dma.done.wait [#allocation9], 2048  }
  0x51   :  { %1315 = vsyncadd [#allocation9], 4294965248 }
  0x52   :  { %1316 = dma.done.wait [#allocation12], 2048  }
  0x53   :  { %1317 = vsyncadd [#allocation12], 4294965248  ;;  %v1329_v0 = vmov 0.0   ;;  %vm1330_vm0 = vmmov 0   ;;  %v1101_v1 = vld [vmem:[#allocation5 + $0x38] sm:$0xff]   ;;  %v1102_v2 = vld [vmem:[#allocation5 + $0x30] sm:$0xff]  }
  0x54   :  { %967 = vmatprep.subr.bf16.mxu0 %v1329_v0  ;;  %983 = vmatprep.mubr.msk.bf16.mxu0 %vm1330_vm0, %v1329_v0  ;;  %v1103_v3 = vld [vmem:[#allocation5 + $0x28] sm:$0xff]   ;;  %v1110_v4 = vld [vmem:[#allocation7 + $0x38] sm:$0xff]   ;;  %v1104_v5 = vld [vmem:[#allocation5 + $0x20] sm:$0xff]   ;;  %s1331_s27 = smov [#allocation14]  }
  0x55   :  { %987 = vmatprep.subr.bf16.mxu1 %v1329_v0  ;;  %1003 = vmatprep.mubr.msk.bf16.mxu1 %vm1330_vm0, %v1329_v0  ;;  %v1111_v6 = vld [vmem:[#allocation7 + $0x30] sm:$0xff]   ;;  %v1105_v7 = vld [vmem:[#allocation5 + $0x18] sm:$0xff]   ;;  %v1112_v8 = vld [vmem:[#allocation7 + $0x28] sm:$0xff]   ;;  %s843_s28 = sshll.u32 %s1331_s27, 4  ;;  %s844_s28 = int_to_ptr.vmem [resolvable:$true] %s843_s28 }
  0x56   :  { %968 = vmatpush3.bf16.msra.mxu0 %v1101_v1  ;;  %988 = vmatpush3.bf16.msra.mxu1 %v1110_v4  ;;  %v1106_v9 = vld [vmem:[#allocation5 + $0x10] sm:$0xff]   ;;  %v1113_v10 = vld [vmem:[#allocation7 + $0x20] sm:$0xff]   ;;  %v1107_v11 = vld [vmem:[#allocation5 + $0x8] sm:$0xff]   ;;  %p1295_p8 = scmp.lt.s32.totalorder %s844_s28, %s844_s28 }
  0x57   :  { %969 = vmatprep.subr.bf16.mxu0 %v1329_v0  ;;  %989 = vmatprep.subr.bf16.mxu1 %v1329_v0  ;;  %v1114_v12 = vld [vmem:[#allocation7 + $0x18] sm:$0xff]   ;;  %v1108_v13 = vld [vmem:[#allocation5] sm:$0xff]   ;;  %v1115_v15 = vld [vmem:[#allocation7 + $0x10] sm:$0xff]  }
  0x58   :  { %v1109_v14 = vld [vmem:[#allocation2] sm:$0xff]   ;;  %v1116_v16 = vld [vmem:[#allocation7 + $0x8] sm:$0xff]   ;;  %v1117_v17 = vld [vmem:[#allocation7] sm:$0xff]  }
  0x59   :  { %v1118_v18 = vld [vmem:[#allocation8 + $0x38] sm:$0xff]   ;;  %v1119_v19 = vld [vmem:[#allocation8 + $0x30] sm:$0xff]   ;;  %v1120_v20 = vld [vmem:[#allocation8 + $0x28] sm:$0xff]  }
  0x5a   :  { %970 = vmatpush3.bf16.msra.mxu0 %v1102_v2  ;;  %990 = vmatpush3.bf16.msra.mxu1 %v1111_v6  ;;  %v1121_v21 = vld [vmem:[#allocation8 + $0x20] sm:$0xff]   ;;  %v1122_v22 = vld [vmem:[#allocation8 + $0x18] sm:$0xff]   ;;  %v1123_v33 = vld [vmem:[#allocation8 + $0x10] sm:$0xff]  }
  0x5b   :  { %971 = vmatprep.subr.bf16.mxu0 %v1329_v0  ;;  %991 = vmatprep.subr.bf16.mxu1 %v1329_v0  ;;  %v858_v23 = vld [vmem:[%s1529_s2] ss:$0 sm:$0xff]  ;;  %v1124_v34 = vld [vmem:[#allocation8 + $0x8] sm:$0xff]   ;;  %v1125_v35 = vld [vmem:[#allocation8] sm:$0xff]  }
  0x5c   :  { %v1126_v36 = vld [vmem:[#allocation10 + $0x38] sm:$0xff]   ;;  %v1127_v37 = vld [vmem:[#allocation10 + $0x30] sm:$0xff]   ;;  %v1128_v38 = vld [vmem:[#allocation10 + $0x28] sm:$0xff]  }
  0x5d   :  { %v1129_v39 = vld [vmem:[#allocation10 + $0x20] sm:$0xff]   ;;  %v1130_v40 = vld [vmem:[#allocation10 + $0x18] sm:$0xff]   ;;  %v1131_v51 = vld [vmem:[#allocation10 + $0x10] sm:$0xff]  }
  0x5e   :  { %972 = vmatpush3.bf16.msra.mxu0 %v1103_v3  ;;  %992 = vmatpush3.bf16.msra.mxu1 %v1112_v8  ;;  %v868_v41 = vld [vmem:[%s1531_s4] ss:$0 sm:$0xff]  ;;  %v1132_v52 = vld [vmem:[#allocation10 + $0x8] sm:$0xff]   ;;  %v1133_v53 = vld [vmem:[#allocation10] sm:$0xff]  }
  0x5f   :  { %973 = vmatprep.subr.bf16.mxu0 %v1329_v0  ;;  %993 = vmatprep.subr.bf16.mxu1 %v1329_v0  ;;  %v1134_v54 = vld [vmem:[#allocation11 + $0x38] sm:$0xff]   ;;  %v1135_v55 = vld [vmem:[#allocation11 + $0x30] sm:$0xff]   ;;  %v1136_v56 = vld [vmem:[#allocation11 + $0x28] sm:$0xff]  }
  0x60   :  { %v1137_v57 = vld [vmem:[#allocation11 + $0x20] sm:$0xff]   ;;  %v1138_v58 = vld [vmem:[#allocation11 + $0x18] sm:$0xff]   ;;  %v1139_v6 = vld [vmem:[#allocation11 + $0x10] sm:$0xff]  }
  0x61   :  { %v877_v59 = vld [vmem:[%s1533_s6] ss:$0 sm:$0xff]  ;;  %v1141_v8 = vld [vmem:[#allocation11] sm:$0xff]  }
  0x62   :  { %974 = vmatpush3.bf16.msra.mxu0 %v1104_v5  ;;  %994 = vmatpush3.bf16.msra.mxu1 %v1113_v10  ;;  %v1143_v10 = vld [vmem:[#allocation13 + $0x30] sm:$0xff]  }
  0x63   :  { %975 = vmatprep.subr.bf16.mxu0 %v1329_v0  ;;  %995 = vmatprep.subr.bf16.mxu1 %v1329_v0 }
  0x66   :  { %976 = vmatpush3.bf16.msra.mxu0 %v1105_v7  ;;  %996 = vmatpush3.bf16.msra.mxu1 %v1114_v12  ;;  %v1140_v7 = vld [vmem:[#allocation11 + $0x8] sm:$0xff]   ;;  %v1145_v12 = vld [vmem:[#allocation13 + $0x20] sm:$0xff]  }
  0x67   :  { %977 = vmatprep.subr.bf16.mxu0 %v1329_v0  ;;  %997 = vmatprep.subr.bf16.mxu1 %v1329_v0 }
  0x6a   :  { %978 = vmatpush3.bf16.msra.mxu0 %v1106_v9  ;;  %998 = vmatpush3.bf16.msra.mxu1 %v1115_v15  ;;  %v1142_v9 = vld [vmem:[#allocation13 + $0x38] sm:$0xff]  }
  0x6b   :  { %979 = vmatprep.subr.bf16.mxu0 %v1329_v0  ;;  %999 = vmatprep.subr.bf16.mxu1 %v1329_v0 }
  0x6e   :  { %980 = vmatpush3.bf16.msra.mxu0 %v1107_v11  ;;  %1000 = vmatpush3.bf16.msra.mxu1 %v1116_v16  ;;  %v1144_v11 = vld [vmem:[#allocation13 + $0x28] sm:$0xff]  }
  0x6f   :  { %981 = vmatprep.subr.bf16.mxu0 %v1329_v0  ;;  %1001 = vmatprep.subr.bf16.mxu1 %v1329_v0 }
  0x72   :  { %982 = vmatpush3.bf16.msra.mxu0 %v1108_v13  ;;  %1002 = vmatpush3.bf16.msra.mxu1 %v1117_v17  ;;  %v1146_v13 = vld [vmem:[#allocation13 + $0x18] sm:$0xff]  }
  0x73   :  { %1007 = vmatprep.subr.bf16.mxu0 %v1329_v0  ;;  %1027 = vmatprep.subr.bf16.mxu1 %v1329_v0 }
  0x75   :  { %984 = vmatmul.mubr.bf16.vlgmr.msra.gmra.mxu0 %v1109_v14  ;;  %v886_v14 = vld [vmem:[%s1535_s8] ss:$0 sm:$0xff] }
  0x76   :  { %1023 = vmatprep.mubr.msk.bf16.mxu0 %vm1330_vm0, %v1329_v0  ;;  %1008 = vmatpush3.bf16.msra.mxu0 %v1118_v18 }
  0x77   :  { %1009 = vmatprep.subr.bf16.mxu0 %v1329_v0 }
  0x7a   :  { %1010 = vmatpush3.bf16.msra.mxu0 %v1119_v19 }
  0x7b   :  { %1011 = vmatprep.subr.bf16.mxu0 %v1329_v0 }
  0x7e   :  { %1012 = vmatpush3.bf16.msra.mxu0 %v1120_v20 }
  0x7f   :  { %1013 = vmatprep.subr.bf16.mxu0 %v1329_v0 }
  0x82   :  { %1014 = vmatpush3.bf16.msra.mxu0 %v1121_v21 }
  0x83   :  { %1015 = vmatprep.subr.bf16.mxu0 %v1329_v0 }
  0x86   :  { %1016 = vmatpush3.bf16.msra.mxu0 %v1122_v22 }
  0x87   :  { %1017 = vmatprep.subr.bf16.mxu0 %v1329_v0 }
  0x8a   :  { %1018 = vmatpush3.bf16.msra.mxu0 %v1123_v33 }
  0x8b   :  { %1019 = vmatprep.subr.bf16.mxu0 %v1329_v0 }
  0x8e   :  { %1020 = vmatpush3.bf16.msra.mxu0 %v1124_v34 }
  0x8f   :  { %1021 = vmatprep.subr.bf16.mxu0 %v1329_v0 }
  0x92   :  { %1022 = vmatpush3.bf16.msra.mxu0 %v1125_v35 }
  0x93   :  { %1047 = vmatprep.subr.bf16.mxu0 %v1329_v0 }
 0x135   :  { %v254_v24 = vpop.f32.mrf.mxu0 }
 0x136   :  { %v255_v26 = vadd.f32 %v858_v23, %v254_v24  ;;  %v1147_v24 = vld [vmem:[#allocation13 + $0x10] sm:$0xff]  }
 0x137   :  { %v985_v25 = vpop.f32.mrf.mxu0 }
 0x138   :  { %v261_v30 = vmax.f32 %v255_v26, 0.0  ;;  %v1148_v25 = vld [vmem:[#allocation13 + $0x8] sm:$0xff]   ;;  %v1149_v26 = vld [vmem:[#allocation13] sm:$0xff]  }
 0x139   :  { %v257_v27 = vpop.f32.mrf.mxu0 }
 0x13a   :  { %v258_v28 = vadd.f32 %v858_v23, %v257_v27  ;;  %v895_v27 = vld [vmem:[%s1537_s10] ss:$0 sm:$0xff]  ;;  %s1290_s10 = scalar_lea.vmem %s844_s28, 256 }
 0x13b   :  { %v986_v29 = vpop.f32.mrf.mxu0  ;;  %p1291_p7 = scmp.ne.s32.totalorder %s844_s28, %s1290_s10  ;;  %p1296_p9 = scmp.lt.s32.totalorder %s1290_s10, %s1290_s10 }
 0x13c   :  { %v262_v31 = vmax.f32 %v258_v28, 0.0 }
 0x13d   :  { %p1297_p10 = por %p1296_p9, %p1295_p8 }
 0x13e   :  { %v263_v32 = vpack.c.bf16 %v262_v31, %v261_v30 }
 0x13f   :  { %p1298_p11 = pnand %p1297_p10, %p1291_p7 }
 0x140   :  { %1004 = vmatmul.mubr.bf16.vlgmr.msra.gmra.mxu1 %v263_v32 }
 0x141   :  { %1043 = vmatprep.mubr.msk.bf16.mxu1 %vm1330_vm0, %v1329_v0  ;;  %1028 = vmatpush3.bf16.msra.mxu1 %v1126_v36 }
 0x142   :  { %1029 = vmatprep.subr.bf16.mxu1 %v1329_v0 }
 0x145   :  { %1030 = vmatpush3.bf16.msra.mxu1 %v1127_v37 }
 0x146   :  { %1031 = vmatprep.subr.bf16.mxu1 %v1329_v0 }
 0x149   :  { %1032 = vmatpush3.bf16.msra.mxu1 %v1128_v38 }
 0x14a   :  { %1033 = vmatprep.subr.bf16.mxu1 %v1329_v0 }
 0x14d   :  { %1034 = vmatpush3.bf16.msra.mxu1 %v1129_v39 }
 0x14e   :  { %1035 = vmatprep.subr.bf16.mxu1 %v1329_v0 }
 0x151   :  { %1036 = vmatpush3.bf16.msra.mxu1 %v1130_v40 }
 0x152   :  { %1037 = vmatprep.subr.bf16.mxu1 %v1329_v0 }
 0x155   :  { %1038 = vmatpush3.bf16.msra.mxu1 %v1131_v51 }
 0x156   :  { %1039 = vmatprep.subr.bf16.mxu1 %v1329_v0 }
 0x159   :  { %1040 = vmatpush3.bf16.msra.mxu1 %v1132_v52 }
 0x15a   :  { %1041 = vmatprep.subr.bf16.mxu1 %v1329_v0 }
 0x15d   :  { %1042 = vmatpush3.bf16.msra.mxu1 %v1133_v53 }
 0x15e   :  { %1067 = vmatprep.subr.bf16.mxu1 %v1329_v0 }
 0x200   :  { %v369_v42 = vpop.f32.mrf.mxu1 }
 0x201   :  { %v370_v44 = vadd.f32 %v868_v41, %v369_v42 }
 0x202   :  { %v1005_v43 = vpop.f32.mrf.mxu1 }
 0x203   :  { %v376_v48 = vmax.f32 %v370_v44, 0.0 }
 0x204   :  { %v372_v45 = vpop.f32.mrf.mxu1 }
 0x205   :  { %v373_v46 = vadd.f32 %v868_v41, %v372_v45 }
 0x206   :  { %v1006_v47 = vpop.f32.mrf.mxu1 }
 0x207   :  { %v377_v49 = vmax.f32 %v373_v46, 0.0 }
 0x209   :  { %v378_v50 = vpack.c.bf16 %v377_v49, %v376_v48 }
 0x20b   :  { %1024 = vmatmul.mubr.bf16.vlgmr.msra.gmra.mxu0 %v378_v50 }
 0x20c   :  { %1063 = vmatprep.mubr.msk.bf16.mxu0 %vm1330_vm0, %v1329_v0  ;;  %1048 = vmatpush3.bf16.msra.mxu0 %v1134_v54 }
 0x20d   :  { %1049 = vmatprep.subr.bf16.mxu0 %v1329_v0 }
 0x210   :  { %1050 = vmatpush3.bf16.msra.mxu0 %v1135_v55 }
 0x211   :  { %1051 = vmatprep.subr.bf16.mxu0 %v1329_v0 }
 0x214   :  { %1052 = vmatpush3.bf16.msra.mxu0 %v1136_v56 }
 0x215   :  { %1053 = vmatprep.subr.bf16.mxu0 %v1329_v0 }
 0x218   :  { %1054 = vmatpush3.bf16.msra.mxu0 %v1137_v57 }
 0x219   :  { %1055 = vmatprep.subr.bf16.mxu0 %v1329_v0 }
 0x21c   :  { %1056 = vmatpush3.bf16.msra.mxu0 %v1138_v58 }
 0x21d   :  { %1057 = vmatprep.subr.bf16.mxu0 %v1329_v0 }
 0x220   :  { %1058 = vmatpush3.bf16.msra.mxu0 %v1139_v6 }
 0x221   :  { %1059 = vmatprep.subr.bf16.mxu0 %v1329_v0 }
 0x224   :  { %1060 = vmatpush3.bf16.msra.mxu0 %v1140_v7 }
 0x225   :  { %1061 = vmatprep.subr.bf16.mxu0 %v1329_v0 }
 0x228   :  { %1062 = vmatpush3.bf16.msra.mxu0 %v1141_v8 }
 0x2cb   :  { %v484_v60 = vpop.f32.mrf.mxu0 }
 0x2cc   :  { %v485_v62 = vadd.f32 %v877_v59, %v484_v60 }
 0x2cd   :  { %v1025_v61 = vpop.f32.mrf.mxu0 }
 0x2ce   :  { %v491_v3 = vmax.f32 %v485_v62, 0.0 }
 0x2cf   :  { %v487_v63 = vpop.f32.mrf.mxu0 }
 0x2d0   :  { %v488_v1 = vadd.f32 %v877_v59, %v487_v63 }
 0x2d1   :  { %v1026_v2 = vpop.f32.mrf.mxu0 }
 0x2d2   :  { %v492_v4 = vmax.f32 %v488_v1, 0.0 }
 0x2d4   :  { %v493_v5 = vpack.c.bf16 %v492_v4, %v491_v3 }
 0x2d6   :  { %1044 = vmatmul.mubr.bf16.vlgmr.msra.gmra.mxu1 %v493_v5 }
 0x2d7   :  { %1083 = vmatprep.mubr.msk.bf16.mxu1 %vm1330_vm0, %v1329_v0  ;;  %1068 = vmatpush3.bf16.msra.mxu1 %v1142_v9 }
 0x2d8   :  { %1069 = vmatprep.subr.bf16.mxu1 %v1329_v0 }
 0x2db   :  { %1070 = vmatpush3.bf16.msra.mxu1 %v1143_v10 }
 0x2dc   :  { %1071 = vmatprep.subr.bf16.mxu1 %v1329_v0 }
 0x2df   :  { %1072 = vmatpush3.bf16.msra.mxu1 %v1144_v11 }
 0x2e0   :  { %1073 = vmatprep.subr.bf16.mxu1 %v1329_v0 }
 0x2e3   :  { %1074 = vmatpush3.bf16.msra.mxu1 %v1145_v12 }
 0x2e4   :  { %1075 = vmatprep.subr.bf16.mxu1 %v1329_v0 }
 0x2e7   :  { %1076 = vmatpush3.bf16.msra.mxu1 %v1146_v13 }
 0x2e8   :  { %1077 = vmatprep.subr.bf16.mxu1 %v1329_v0 }
 0x2eb   :  { %1078 = vmatpush3.bf16.msra.mxu1 %v1147_v24 }
 0x2ec   :  { %1079 = vmatprep.subr.bf16.mxu1 %v1329_v0 }
 0x2ef   :  { %1080 = vmatpush3.bf16.msra.mxu1 %v1148_v25 }
 0x2f0   :  { %1081 = vmatprep.subr.bf16.mxu1 %v1329_v0  ;;  %v904_v0 = vld [vmem:[%s1539_s12] ss:$0 sm:$0xff] }
 0x2f3   :  { %1082 = vmatpush3.bf16.msra.mxu1 %v1149_v26 }
 0x396   :  { %v599_v15 = vpop.f32.mrf.mxu1 }
 0x397   :  { %v600_v17 = vadd.f32 %v886_v14, %v599_v15 }
 0x398   :  { %v1045_v16 = vpop.f32.mrf.mxu1 }
 0x399   :  { %v606_v21 = vmax.f32 %v600_v17, 0.0 }
 0x39a   :  { %v602_v18 = vpop.f32.mrf.mxu1 }
 0x39b   :  { %v603_v19 = vadd.f32 %v886_v14, %v602_v18 }
 0x39c   :  { %v1046_v20 = vpop.f32.mrf.mxu1 }
 0x39d   :  { %v607_v22 = vmax.f32 %v603_v19, 0.0 }
 0x39f   :  { %v608_v23 = vpack.c.bf16 %v607_v22, %v606_v21 }
 0x3a1   :  { %1064 = vmatmul.mubr.bf16.vlgmr.msra.gmra.mxu0 %v608_v23 }
 0x461   :  { %v714_v28 = vpop.f32.mrf.mxu0 }
 0x462   :  { %v715_v30 = vadd.f32 %v895_v27, %v714_v28 }
 0x463   :  { %v1065_v29 = vpop.f32.mrf.mxu0 }
 0x464   :  { %v721_v34 = vmax.f32 %v715_v30, 0.0 }
 0x465   :  { %v717_v31 = vpop.f32.mrf.mxu0 }
 0x466   :  { %v718_v32 = vadd.f32 %v895_v27, %v717_v31 }
 0x467   :  { %v1066_v33 = vpop.f32.mrf.mxu0 }
 0x468   :  { %v722_v35 = vmax.f32 %v718_v32, 0.0 }
 0x46a   :  { %v723_v36 = vpack.c.bf16 %v722_v35, %v721_v34 }
 0x46c   :  { %1084 = vmatmul.mubr.bf16.vlgmr.msra.gmra.mxu1 %v723_v36 }
 0x52c   :  { %v829_v37 = vpop.f32.mrf.mxu1 }
 0x52d   :  { %v830_v38 = vadd.f32 %v904_v0, %v829_v37 }
 0x52e   :  { %v1085_v39 = vpop.f32.mrf.mxu1 }
 0x52f   :  { %836 = vst [vmem:[#allocation14] sm:$0xff] %v830_v38 }
 0x530   :  { %v832_v40 = vpop.f32.mrf.mxu1 }
 0x531   :  { %v833_v41 = vadd.f32 %v904_v0, %v832_v40 }
 0x532   :  { %v1086_v42 = vpop.f32.mrf.mxu1 }
 0x533   :  { %837 = vst [vmem:[#allocation14 + $0x8] sm:$0xff] %v833_v41 }
 0x534   :  { %1301 = shalt.err (!%p1298_p11)
}
 0x535   :  { %s1332_s29 = smov 128   ;;  %s1333_s12 = smov 8  }
 0x536   :  { %849 = dma.vmem_to_hbm [thread:$0]  %s844_s28, 256, %s1540_s13, [#allocation4], %s1332_s29, %s1332_s29, %s1333_s12  }
 0x537   :  { %1318 = dma.done.wait [#allocation4], 256  }
 0x538   :  { %1319 = vsyncadd [#allocation4], 4294967040 }
 0x539   :  { %853 = vsyncpa [#allocation3], 1 }
 0x53a   :  { %854 = vsyncpa [#allocation6], 1 }
 0x53b   :  { %855 = vsyncpa [#allocation9], 1 }
 0x53c   :  { %856 = vsyncpa [#allocation12], 1 }
 0x53d   :  { %857 = vsyncpa [#allocation4], 1 }

</bundles_post_ra>
